<compile_context>
chip_gen: v5e
topology: v5e:2x2
jax: 0.10.0
libtpu: 0.0.40
codegen_flags: <defaults>
</compile_context>

<pallas_src>
import jax
import jax.numpy as jnp
from jax.experimental import pallas as pl
from jax.experimental.pallas import tpu as pltpu

_LN_EPS = 1e-5
_P = jax.lax.Precision.HIGHEST  # used only by the pure-JAX reference


def _layernorm(x, gamma, beta):
    # x: (..., D), gamma/beta: (1, D)
    mu = jnp.mean(x, axis=-1, keepdims=True)
    xc = x - mu
    var = jnp.mean(xc * xc, axis=-1, keepdims=True)
    return xc * jax.lax.rsqrt(var + _LN_EPS) * gamma + beta


def _gelu(x):
    # exact (erf) GELU, matching torch.nn.GELU() default
    return 0.5 * x * (1.0 + jax.lax.erf(x * 0.7071067811865476))


def _mm(a, b):
    # single-pass bf16 MXU matmul with f32 accumulation
    return jnp.dot(a.astype(jnp.bfloat16), b.astype(jnp.bfloat16),
                   preferred_element_type=jnp.float32)


def _link_kernel(
    lst_ref, lnk_ref,                               # activation halves, (R, D/2) each
    ln1_g, ln1_b, w1c_bd, b1c_bd, w2c_bd, b2c_bd,   # chan_update (block-diag conv weights)
    ln2_g, ln2_b, w1l, b1l, w2l, b2l,               # inner_update
    ln3_g, ln3_b,                                   # final norm
    sel_even,                                       # (D, D/2) 0/1 even-lane compactor
    out_ref,                                        # (R, D/2)
    xbuf,                                           # VMEM scratch (R, D) f32
):
    # ---- assemble x = concat(l_st, link) along lanes, once, in VMEM scratch
    dh = lst_ref.shape[-1]
    xbuf[:, :dh] = lst_ref[...]
    xbuf[:, dh:] = lnk_ref[...]
    x = xbuf[...]                                   # (R, D) float32

    # ---- chan_update: LN -> Conv1d(N->IC,k=1) -> GELU -> Conv1d(IC->N,k=1), + residual
    # Conv1d(k=1) over the flattened (bt*N, D) rows == block-diagonal matmul.
    h = _layernorm(x, ln1_g[...], ln1_b[...])                       # (R, D)
    h = _gelu(_mm(w1c_bd[...], h) + b1c_bd[...])                    # (bt*IC, D)
    x = x + _mm(w2c_bd[...], h) + b2c_bd[...]                       # (R, D)

    # ---- inner_update: LN -> Linear(D->ID) -> GELU -> Linear(ID->D), + residual
    h = _layernorm(x, ln2_g[...], ln2_b[...])                       # (R, D)
    h = _gelu(_mm(h, w1l[...]) + b1l[...])                          # (R, ID)
    x = x + _mm(h, w2l[...]) + b2l[...]                             # (R, D)

    # ---- final LayerNorm + MaxPool1d(2) along the feature dim.
    # lane-roll by -1 (== +D-1 circular) puts x[2k+1] under lane 2k; max is VPU;
    # a single 0/1 selection matmul compacts the even lanes to D//2.
    xn = _layernorm(x, ln3_g[...], ln3_b[...])                      # (R, D)
    d = xn.shape[-1]
    nxt = pltpu.roll(xn, d - 1, 1)                                  # lane i <- xn[i+1]
    paired = jnp.maximum(xn, nxt)                                   # even lanes hold pair max
    out_ref[...] = _mm(paired, sel_even[...])                       # (R, D//2)


def _full_spec(shape):
    return pl.BlockSpec(shape, lambda i, _s=shape: (0,) * len(_s))


def _pick_batch_tile(batch, n, target_rows=256):
    """Largest bt such that bt | batch, the block's sublane dim (bt*n) is a
    multiple of 8 (or the block covers the whole batch), block rows stay near
    target_rows, and (when batch >= 2) at least 2 grid steps remain so v7x's
    two TensorCores both get work."""
    valid = [bt for bt in range(1, batch + 1)
             if batch % bt == 0 and ((bt * n) % 8 == 0 or bt == batch)]
    pref = [bt for bt in valid
            if bt * n <= target_rows and (batch // bt >= 2 or batch < 2)]
    return max(pref) if pref else max(valid)


def link_model_forward(l_st, link, batch, params, *, batch_tile=None, target_rows=256):
    """JAX/Pallas equivalent of LinkModel.forward. Returns (batch*N, D//2)."""
    bn = l_st.shape[0]
    assert link.shape[0] == bn
    n = bn // batch
    d1, d2 = l_st.shape[1], link.shape[1]
    d = d1 + d2
    d_out = d // 2

    bt = batch_tile if batch_tile is not None else _pick_batch_tile(batch, n, target_rows)
    assert batch % bt == 0
    rows = bt * n
    grid = (batch // bt,)

    # MaxPool1d(2) even-lane compaction matrix (0/1 -> exact in bf16).
    sel_even = jnp.eye(d, dtype=jnp.float32)[:, 0::2].astype(jnp.bfloat16)   # (D, D//2)

    # Block-diagonal Conv1d(k=1) weights for the flattened (bt*n, d) layout.
    eye_bt = jnp.eye(bt, dtype=jnp.float32)
    w1c_bd = jnp.kron(eye_bt, params["w1c"]).astype(jnp.bfloat16)   # (bt*IC, bt*N)
    w2c_bd = jnp.kron(eye_bt, params["w2c"]).astype(jnp.bfloat16)   # (bt*N, bt*IC)
    b1c_bd = jnp.tile(params["b1c"], (bt, 1))                       # (bt*IC, 1)
    b2c_bd = jnp.tile(params["b2c"], (bt, 1))                       # (bt*N, 1)

    param_list = [
        params["ln1_g"], params["ln1_b"], w1c_bd, b1c_bd, w2c_bd, b2c_bd,
        params["ln2_g"], params["ln2_b"],
        params["w1l"].astype(jnp.bfloat16), params["b1l"],
        params["w2l"].astype(jnp.bfloat16), params["b2l"],
        params["ln3_g"], params["ln3_b"],
        sel_even,
    ]

    in_specs = [
        pl.BlockSpec((rows, d1), lambda i: (i, 0)),
        pl.BlockSpec((rows, d2), lambda i: (i, 0)),
    ]
    in_specs += [_full_spec(p.shape) for p in param_list]

    out = pl.pallas_call(
        _link_kernel,
        out_shape=jax.ShapeDtypeStruct((bn, d_out), jnp.float32),
        grid_spec=pltpu.PrefetchScalarGridSpec(
            num_scalar_prefetch=0,
            grid=grid,
            in_specs=in_specs,
            out_specs=pl.BlockSpec((rows, d_out), lambda i: (i, 0)),
            scratch_shapes=[pltpu.VMEM((rows, d), jnp.float32)],
        ),
        compiler_params=pltpu.CompilerParams(
            dimension_semantics=("parallel",),
        ),
    )(l_st.astype(jnp.float32), link.astype(jnp.float32), *param_list)

    return out   # already in "(b n) d" layout


def init_params(key, channel, dim, exp_rate=0.5):
    """Deterministic synthetic parameters (shapes follow LinkModel.__init__).

    Linear weights are stored pre-transposed (in, out) so that y = x @ W;
    Conv1d(k=1) weights are stored squeezed as (out_channels, in_channels)."""
    ic = int(channel * exp_rate)
    idim = int(dim * exp_rate)
    ks = jax.random.split(key, 14)
    nrm = lambda k, s, sc: (sc * jax.random.normal(k, s)).astype(jnp.float32)
    return dict(
        ln1_g=1.0 + nrm(ks[0], (1, dim), 0.1),
        ln1_b=nrm(ks[1], (1, dim), 0.1),
        w1c=nrm(ks[2], (ic, channel), 0.2),
        b1c=nrm(ks[3], (ic, 1), 0.1),
        w2c=nrm(ks[4], (channel, ic), 0.2),
        b2c=nrm(ks[5], (channel, 1), 0.1),
        ln2_g=1.0 + nrm(ks[6], (1, dim), 0.1),
        ln2_b=nrm(ks[7], (1, dim), 0.1),
        w1l=nrm(ks[8], (dim, idim), 0.1),
        b1l=nrm(ks[9], (1, idim), 0.1),
        w2l=nrm(ks[10], (idim, dim), 0.1),
        b2l=nrm(ks[11], (1, dim), 0.1),
        ln3_g=1.0 + nrm(ks[12], (1, dim), 0.1),
        ln3_b=nrm(ks[13], (1, dim), 0.1),
    )


def reference_forward(l_st, link, batch, p):
    """Pure-JAX f32 (HIGHEST precision) reference mirroring the PyTorch forward."""
    x = jnp.concatenate([l_st, link], axis=1)
    bn, d = x.shape
    n = bn // batch
    x = x.reshape(batch, n, d).astype(jnp.float32)

    h = _layernorm(x, p["ln1_g"], p["ln1_b"])
    h = jnp.einsum("oc,bcd->bod", p["w1c"], h, precision=_P) + p["b1c"][None]
    h = _gelu(h)
    h = jnp.einsum("oc,bcd->bod", p["w2c"], h, precision=_P) + p["b2c"][None]
    x = x + h

    h = _layernorm(x, p["ln2_g"], p["ln2_b"])
    h = jnp.einsum("bnd,de->bne", h, p["w1l"], precision=_P) + p["b1l"][None]
    h = _gelu(h)
    h = jnp.einsum("bne,ed->bnd", h, p["w2l"], precision=_P) + p["b2l"][None]
    x = x + h

    xn = _layernorm(x, p["ln3_g"], p["ln3_b"])
    out = jnp.max(xn.reshape(batch, n, d // 2, 2), axis=-1)   # MaxPool1d(2)
    return out.reshape(batch * n, d // 2)


if __name__ == "__main__":
    batch, channel, dim = 8, 8, 128     # B=8, N=8 "channels", feature dim 128
    key = jax.random.PRNGKey(0)
    k_a, k_b, k_p = jax.random.split(key, 3)

    d_half = dim // 2
    l_st = jax.random.normal(k_a, (batch * channel, d_half), jnp.float32)
    link = jax.random.normal(k_b, (batch * channel, dim - d_half), jnp.float32)
    params = init_params(k_p, channel, dim)

    out = link_model_forward(l_st, link, batch, params)
    out = jax.block_until_ready(out)

    ref = reference_forward(l_st, link, batch, params)
    assert out.shape == (batch * channel, dim // 2), out.shape
    max_err = float(jnp.max(jnp.abs(out - ref)))
    # kernel runs single-pass bf16 matmuls; compare against the f32 reference
    # with a bf16-appropriate tolerance
    assert bool(jnp.allclose(out, ref, rtol=3e-2, atol=3e-2)), max_err
    print("KERNEL_OK")
</pallas_src>

<mosaic_0001>
module attributes {stable_mosaic.version = 11 : i64} {
  func.func @_link_kernel(%arg0: i32, %arg1: memref<32x64xf32, #tpu.memory_space<vmem>>, %arg2: memref<32x64xf32, #tpu.memory_space<vmem>>, %arg3: memref<1x128xf32, #tpu.memory_space<vmem>>, %arg4: memref<1x128xf32, #tpu.memory_space<vmem>>, %arg5: memref<16x32xbf16, #tpu.memory_space<vmem>>, %arg6: memref<16x1xf32, #tpu.memory_space<vmem>>, %arg7: memref<32x16xbf16, #tpu.memory_space<vmem>>, %arg8: memref<32x1xf32, #tpu.memory_space<vmem>>, %arg9: memref<1x128xf32, #tpu.memory_space<vmem>>, %arg10: memref<1x128xf32, #tpu.memory_space<vmem>>, %arg11: memref<128x64xbf16, #tpu.memory_space<vmem>>, %arg12: memref<1x64xf32, #tpu.memory_space<vmem>>, %arg13: memref<64x128xbf16, #tpu.memory_space<vmem>>, %arg14: memref<1x128xf32, #tpu.memory_space<vmem>>, %arg15: memref<1x128xf32, #tpu.memory_space<vmem>>, %arg16: memref<1x128xf32, #tpu.memory_space<vmem>>, %arg17: memref<128x64xbf16, #tpu.memory_space<vmem>>, %arg18: memref<32x64xf32, #tpu.memory_space<vmem>>, %arg19: memref<32x128xf32, #tpu.memory_space<vmem>>) attributes {dimension_semantics = [#tpu.dimension_semantics<parallel>], iteration_bounds = array<i64: 2>, scalar_prefetch = 0 : i64, scratch_operands = 1 : i64, tpu.core_type = #tpu.core_type<tc>, window_params = [{transform_indices = @transform_0, window_bounds = array<i64: 32, 64>}, {transform_indices = @transform_1, window_bounds = array<i64: 32, 64>}, {pipeline_mode = #tpu.pipeline_mode<synchronous>, transform_indices = @transform_2, window_bounds = array<i64: 1, 128>}, {pipeline_mode = #tpu.pipeline_mode<synchronous>, transform_indices = @transform_3, window_bounds = array<i64: 1, 128>}, {pipeline_mode = #tpu.pipeline_mode<synchronous>, transform_indices = @transform_4, window_bounds = array<i64: 16, 32>}, {pipeline_mode = #tpu.pipeline_mode<synchronous>, transform_indices = @transform_5, window_bounds = array<i64: 16, 1>}, {pipeline_mode = #tpu.pipeline_mode<synchronous>, transform_indices = @transform_6, window_bounds = array<i64: 32, 16>}, {pipeline_mode = #tpu.pipeline_mode<synchronous>, transform_indices = @transform_7, window_bounds = array<i64: 32, 1>}, {pipeline_mode = #tpu.pipeline_mode<synchronous>, transform_indices = @transform_8, window_bounds = array<i64: 1, 128>}, {pipeline_mode = #tpu.pipeline_mode<synchronous>, transform_indices = @transform_9, window_bounds = array<i64: 1, 128>}, {pipeline_mode = #tpu.pipeline_mode<synchronous>, transform_indices = @transform_10, window_bounds = array<i64: 128, 64>}, {pipeline_mode = #tpu.pipeline_mode<synchronous>, transform_indices = @transform_11, window_bounds = array<i64: 1, 64>}, {pipeline_mode = #tpu.pipeline_mode<synchronous>, transform_indices = @transform_12, window_bounds = array<i64: 64, 128>}, {pipeline_mode = #tpu.pipeline_mode<synchronous>, transform_indices = @transform_13, window_bounds = array<i64: 1, 128>}, {pipeline_mode = #tpu.pipeline_mode<synchronous>, transform_indices = @transform_14, window_bounds = array<i64: 1, 128>}, {pipeline_mode = #tpu.pipeline_mode<synchronous>, transform_indices = @transform_15, window_bounds = array<i64: 1, 128>}, {pipeline_mode = #tpu.pipeline_mode<synchronous>, transform_indices = @transform_16, window_bounds = array<i64: 128, 64>}, {transform_indices = @transform_17, window_bounds = array<i64: 32, 64>}]} {
    %c0 = arith.constant 0 : index
    %c0_0 = arith.constant 0 : index
    %0 = vector.load %arg1[%c0, %c0_0] : memref<32x64xf32, #tpu.memory_space<vmem>>, vector<32x64xf32>
    %c0_1 = arith.constant 0 : index
    %c0_2 = arith.constant 0 : index
    %1 = vector.load %arg19[%c0_1, %c0_2] : memref<32x128xf32, #tpu.memory_space<vmem>>, vector<32x64xf32>
    tpu.vector_store %arg19[%c0_1, %c0_2], %0 {strides = array<i32>} : memref<32x128xf32, #tpu.memory_space<vmem>>, vector<32x64xf32>,
    %c0_3 = arith.constant 0 : index
    %c0_4 = arith.constant 0 : index
    %2 = vector.load %arg2[%c0_3, %c0_4] : memref<32x64xf32, #tpu.memory_space<vmem>>, vector<32x64xf32>
    %c0_5 = arith.constant 0 : index
    %c64 = arith.constant 64 : index
    %3 = vector.load %arg19[%c0_5, %c64] : memref<32x128xf32, #tpu.memory_space<vmem>>, vector<32x64xf32>
    tpu.vector_store %arg19[%c0_5, %c64], %2 {strides = array<i32>} : memref<32x128xf32, #tpu.memory_space<vmem>>, vector<32x64xf32>,
    %c0_6 = arith.constant 0 : index
    %c0_7 = arith.constant 0 : index
    %4 = vector.load %arg19[%c0_6, %c0_7] : memref<32x128xf32, #tpu.memory_space<vmem>>, vector<32x128xf32>
    %c0_8 = arith.constant 0 : index
    %c0_9 = arith.constant 0 : index
    %5 = vector.load %arg3[%c0_8, %c0_9] : memref<1x128xf32, #tpu.memory_space<vmem>>, vector<1x128xf32>
    %c0_10 = arith.constant 0 : index
    %c0_11 = arith.constant 0 : index
    %6 = vector.load %arg4[%c0_10, %c0_11] : memref<1x128xf32, #tpu.memory_space<vmem>>, vector<1x128xf32>
    %cst = arith.constant dense<0.000000e+00> : vector<32xf32>
    %7 = vector.multi_reduction <add>, %4, %cst [1] : vector<32x128xf32> to vector<32xf32>
    %8 = vector.shape_cast %7 : vector<32xf32> to vector<32x1xf32>
    %cst_12 = arith.constant 1.280000e+02 : f32
    %9 = vector.broadcast %cst_12 : f32 to vector<32x1xf32>
    %10 = arith.divf %8, %9 : vector<32x1xf32>
    %11 = vector.broadcast %10 : vector<32x1xf32> to vector<32x128xf32>
    %12 = arith.subf %4, %11 : vector<32x128xf32>
    %13 = arith.mulf %12, %12 : vector<32x128xf32>
    %cst_13 = arith.constant dense<0.000000e+00> : vector<32xf32>
    %14 = vector.multi_reduction <add>, %13, %cst_13 [1] : vector<32x128xf32> to vector<32xf32>
    %15 = vector.shape_cast %14 : vector<32xf32> to vector<32x1xf32>
    %cst_14 = arith.constant 1.280000e+02 : f32
    %16 = vector.broadcast %cst_14 : f32 to vector<32x1xf32>
    %17 = arith.divf %15, %16 : vector<32x1xf32>
    %cst_15 = arith.constant 9.99999974E-6 : f32
    %18 = vector.broadcast %cst_15 : f32 to vector<32x1xf32>
    %19 = arith.addf %17, %18 : vector<32x1xf32>
    %20 = math.rsqrt %19 : vector<32x1xf32>
    %21 = vector.broadcast %20 : vector<32x1xf32> to vector<32x128xf32>
    %22 = arith.mulf %12, %21 : vector<32x128xf32>
    %23 = vector.broadcast %5 : vector<1x128xf32> to vector<32x128xf32>
    %24 = arith.mulf %22, %23 : vector<32x128xf32>
    %25 = vector.broadcast %6 : vector<1x128xf32> to vector<32x128xf32>
    %26 = arith.addf %24, %25 : vector<32x128xf32>
    %c0_16 = arith.constant 0 : index
    %c0_17 = arith.constant 0 : index
    %27 = vector.load %arg5[%c0_16, %c0_17] : memref<16x32xbf16, #tpu.memory_space<vmem>>, vector<16x32xbf16>
    %28 = arith.truncf %26 : vector<32x128xf32> to vector<32x128xbf16>
    %cst_18 = arith.constant dense<0.000000e+00> : vector<16x128xf32>
    %29 = tpu.matmul %27, %28, %cst_18 {dimension_numbers = #tpu.dot_dimension_numbers<[1], [0], [0], [1], [0, 0, 1, 1], [], []>} : vector<16x32xbf16>, vector<32x128xbf16>, vector<16x128xf32> -> vector<16x128xf32>
    %c0_19 = arith.constant 0 : index
    %c0_20 = arith.constant 0 : index
    %30 = vector.load %arg6[%c0_19, %c0_20] : memref<16x1xf32, #tpu.memory_space<vmem>>, vector<16x1xf32>
    %31 = vector.broadcast %30 : vector<16x1xf32> to vector<16x128xf32>
    %32 = arith.addf %29, %31 : vector<16x128xf32>
    %cst_21 = arith.constant 5.000000e-01 : f32
    %33 = vector.broadcast %cst_21 : f32 to vector<16x128xf32>
    %34 = arith.mulf %33, %32 : vector<16x128xf32>
    %cst_22 = arith.constant 0.707106769 : f32
    %35 = vector.broadcast %cst_22 : f32 to vector<16x128xf32>
    %36 = arith.mulf %32, %35 : vector<16x128xf32>
    %37 = math.erf %36 : vector<16x128xf32>
    %cst_23 = arith.constant 1.000000e+00 : f32
    %38 = vector.broadcast %cst_23 : f32 to vector<16x128xf32>
    %39 = arith.addf %38, %37 : vector<16x128xf32>
    %40 = arith.mulf %34, %39 : vector<16x128xf32>
    %c0_24 = arith.constant 0 : index
    %c0_25 = arith.constant 0 : index
    %41 = vector.load %arg7[%c0_24, %c0_25] : memref<32x16xbf16, #tpu.memory_space<vmem>>, vector<32x16xbf16>
    %42 = arith.truncf %40 : vector<16x128xf32> to vector<16x128xbf16>
    %cst_26 = arith.constant dense<0.000000e+00> : vector<32x128xf32>
    %43 = tpu.matmul %41, %42, %cst_26 {dimension_numbers = #tpu.dot_dimension_numbers<[1], [0], [0], [1], [0, 0, 1, 1], [], []>} : vector<32x16xbf16>, vector<16x128xbf16>, vector<32x128xf32> -> vector<32x128xf32>
    %44 = arith.addf %4, %43 : vector<32x128xf32>
    %c0_27 = arith.constant 0 : index
    %c0_28 = arith.constant 0 : index
    %45 = vector.load %arg8[%c0_27, %c0_28] : memref<32x1xf32, #tpu.memory_space<vmem>>, vector<32x1xf32>
    %46 = vector.broadcast %45 : vector<32x1xf32> to vector<32x128xf32>
    %47 = arith.addf %44, %46 : vector<32x128xf32>
    %c0_29 = arith.constant 0 : index
    %c0_30 = arith.constant 0 : index
    %48 = vector.load %arg9[%c0_29, %c0_30] : memref<1x128xf32, #tpu.memory_space<vmem>>, vector<1x128xf32>
    %c0_31 = arith.constant 0 : index
    %c0_32 = arith.constant 0 : index
    %49 = vector.load %arg10[%c0_31, %c0_32] : memref<1x128xf32, #tpu.memory_space<vmem>>, vector<1x128xf32>
    %cst_33 = arith.constant dense<0.000000e+00> : vector<32xf32>
    %50 = vector.multi_reduction <add>, %47, %cst_33 [1] : vector<32x128xf32> to vector<32xf32>
    %51 = vector.shape_cast %50 : vector<32xf32> to vector<32x1xf32>
    %cst_34 = arith.constant 1.280000e+02 : f32
    %52 = vector.broadcast %cst_34 : f32 to vector<32x1xf32>
    %53 = arith.divf %51, %52 : vector<32x1xf32>
    %54 = vector.broadcast %53 : vector<32x1xf32> to vector<32x128xf32>
    %55 = arith.subf %47, %54 : vector<32x128xf32>
    %56 = arith.mulf %55, %55 : vector<32x128xf32>
    %cst_35 = arith.constant dense<0.000000e+00> : vector<32xf32>
    %57 = vector.multi_reduction <add>, %56, %cst_35 [1] : vector<32x128xf32> to vector<32xf32>
    %58 = vector.shape_cast %57 : vector<32xf32> to vector<32x1xf32>
    %cst_36 = arith.constant 1.280000e+02 : f32
    %59 = vector.broadcast %cst_36 : f32 to vector<32x1xf32>
    %60 = arith.divf %58, %59 : vector<32x1xf32>
    %cst_37 = arith.constant 9.99999974E-6 : f32
    %61 = vector.broadcast %cst_37 : f32 to vector<32x1xf32>
    %62 = arith.addf %60, %61 : vector<32x1xf32>
    %63 = math.rsqrt %62 : vector<32x1xf32>
    %64 = vector.broadcast %63 : vector<32x1xf32> to vector<32x128xf32>
    %65 = arith.mulf %55, %64 : vector<32x128xf32>
    %66 = vector.broadcast %48 : vector<1x128xf32> to vector<32x128xf32>
    %67 = arith.mulf %65, %66 : vector<32x128xf32>
    %68 = vector.broadcast %49 : vector<1x128xf32> to vector<32x128xf32>
    %69 = arith.addf %67, %68 : vector<32x128xf32>
    %c0_38 = arith.constant 0 : index
    %c0_39 = arith.constant 0 : index
    %70 = vector.load %arg11[%c0_38, %c0_39] : memref<128x64xbf16, #tpu.memory_space<vmem>>, vector<128x64xbf16>
    %71 = arith.truncf %69 : vector<32x128xf32> to vector<32x128xbf16>
    %cst_40 = arith.constant dense<0.000000e+00> : vector<32x64xf32>
    %72 = tpu.matmul %71, %70, %cst_40 {dimension_numbers = #tpu.dot_dimension_numbers<[1], [0], [0], [1], [0, 0, 1, 1], [], []>} : vector<32x128xbf16>, vector<128x64xbf16>, vector<32x64xf32> -> vector<32x64xf32>
    %c0_41 = arith.constant 0 : index
    %c0_42 = arith.constant 0 : index
    %73 = vector.load %arg12[%c0_41, %c0_42] : memref<1x64xf32, #tpu.memory_space<vmem>>, vector<1x64xf32>
    %74 = vector.broadcast %73 : vector<1x64xf32> to vector<32x64xf32>
    %75 = arith.addf %72, %74 : vector<32x64xf32>
    %cst_43 = arith.constant 5.000000e-01 : f32
    %76 = vector.broadcast %cst_43 : f32 to vector<32x64xf32>
    %77 = arith.mulf %76, %75 : vector<32x64xf32>
    %cst_44 = arith.constant 0.707106769 : f32
    %78 = vector.broadcast %cst_44 : f32 to vector<32x64xf32>
    %79 = arith.mulf %75, %78 : vector<32x64xf32>
    %80 = math.erf %79 : vector<32x64xf32>
    %cst_45 = arith.constant 1.000000e+00 : f32
    %81 = vector.broadcast %cst_45 : f32 to vector<32x64xf32>
    %82 = arith.addf %81, %80 : vector<32x64xf32>
    %83 = arith.mulf %77, %82 : vector<32x64xf32>
    %c0_46 = arith.constant 0 : index
    %c0_47 = arith.constant 0 : index
    %84 = vector.load %arg13[%c0_46, %c0_47] : memref<64x128xbf16, #tpu.memory_space<vmem>>, vector<64x128xbf16>
    %85 = arith.truncf %83 : vector<32x64xf32> to vector<32x64xbf16>
    %cst_48 = arith.constant dense<0.000000e+00> : vector<32x128xf32>
    %86 = tpu.matmul %85, %84, %cst_48 {dimension_numbers = #tpu.dot_dimension_numbers<[1], [0], [0], [1], [0, 0, 1, 1], [], []>} : vector<32x64xbf16>, vector<64x128xbf16>, vector<32x128xf32> -> vector<32x128xf32>
    %87 = arith.addf %47, %86 : vector<32x128xf32>
    %c0_49 = arith.constant 0 : index
    %c0_50 = arith.constant 0 : index
    %88 = vector.load %arg14[%c0_49, %c0_50] : memref<1x128xf32, #tpu.memory_space<vmem>>, vector<1x128xf32>
    %89 = vector.broadcast %88 : vector<1x128xf32> to vector<32x128xf32>
    %90 = arith.addf %87, %89 : vector<32x128xf32>
    %c0_51 = arith.constant 0 : index
    %c0_52 = arith.constant 0 : index
    %91 = vector.load %arg15[%c0_51, %c0_52] : memref<1x128xf32, #tpu.memory_space<vmem>>, vector<1x128xf32>
    %c0_53 = arith.constant 0 : index
    %c0_54 = arith.constant 0 : index
    %92 = vector.load %arg16[%c0_53, %c0_54] : memref<1x128xf32, #tpu.memory_space<vmem>>, vector<1x128xf32>
    %cst_55 = arith.constant dense<0.000000e+00> : vector<32xf32>
    %93 = vector.multi_reduction <add>, %90, %cst_55 [1] : vector<32x128xf32> to vector<32xf32>
    %94 = vector.shape_cast %93 : vector<32xf32> to vector<32x1xf32>
    %cst_56 = arith.constant 1.280000e+02 : f32
    %95 = vector.broadcast %cst_56 : f32 to vector<32x1xf32>
    %96 = arith.divf %94, %95 : vector<32x1xf32>
    %97 = vector.broadcast %96 : vector<32x1xf32> to vector<32x128xf32>
    %98 = arith.subf %90, %97 : vector<32x128xf32>
    %99 = arith.mulf %98, %98 : vector<32x128xf32>
    %cst_57 = arith.constant dense<0.000000e+00> : vector<32xf32>
    %100 = vector.multi_reduction <add>, %99, %cst_57 [1] : vector<32x128xf32> to vector<32xf32>
    %101 = vector.shape_cast %100 : vector<32xf32> to vector<32x1xf32>
    %cst_58 = arith.constant 1.280000e+02 : f32
    %102 = vector.broadcast %cst_58 : f32 to vector<32x1xf32>
    %103 = arith.divf %101, %102 : vector<32x1xf32>
    %cst_59 = arith.constant 9.99999974E-6 : f32
    %104 = vector.broadcast %cst_59 : f32 to vector<32x1xf32>
    %105 = arith.addf %103, %104 : vector<32x1xf32>
    %106 = math.rsqrt %105 : vector<32x1xf32>
    %107 = vector.broadcast %106 : vector<32x1xf32> to vector<32x128xf32>
    %108 = arith.mulf %98, %107 : vector<32x128xf32>
    %109 = vector.broadcast %91 : vector<1x128xf32> to vector<32x128xf32>
    %110 = arith.mulf %108, %109 : vector<32x128xf32>
    %111 = vector.broadcast %92 : vector<1x128xf32> to vector<32x128xf32>
    %112 = arith.addf %110, %111 : vector<32x128xf32>
    %c127_i32 = arith.constant 127 : i32
    %113 = tpu.dynamic_rotate %112 by %c127_i32 dim 1 : vector<32x128xf32>, i32 -> vector<32x128xf32>
    %114 = arith.maximumf %112, %113 : vector<32x128xf32>
    %c0_60 = arith.constant 0 : index
    %c0_61 = arith.constant 0 : index
    %115 = vector.load %arg17[%c0_60, %c0_61] : memref<128x64xbf16, #tpu.memory_space<vmem>>, vector<128x64xbf16>
    %116 = arith.truncf %114 : vector<32x128xf32> to vector<32x128xbf16>
    %cst_62 = arith.constant dense<0.000000e+00> : vector<32x64xf32>
    %117 = tpu.matmul %116, %115, %cst_62 {dimension_numbers = #tpu.dot_dimension_numbers<[1], [0], [0], [1], [0, 0, 1, 1], [], []>} : vector<32x128xbf16>, vector<128x64xbf16>, vector<32x64xf32> -> vector<32x64xf32>
    %c0_63 = arith.constant 0 : index
    %c0_64 = arith.constant 0 : index
    %118 = vector.load %arg18[%c0_63, %c0_64] : memref<32x64xf32, #tpu.memory_space<vmem>>, vector<32x64xf32>
    tpu.vector_store %arg18[%c0_63, %c0_64], %117 {strides = array<i32>} : memref<32x64xf32, #tpu.memory_space<vmem>>, vector<32x64xf32>,
    return
  }
  func.func @transform_0(%arg0: i32) -> (i32, i32) {
    %c0_i32 = arith.constant 0 : i32
    %c0_i32_0 = arith.constant 0 : i32
    return %arg0, %c0_i32 : i32, i32
  }
  func.func @transform_1(%arg0: i32) -> (i32, i32) {
    %c0_i32 = arith.constant 0 : i32
    %c0_i32_0 = arith.constant 0 : i32
    return %arg0, %c0_i32 : i32, i32
  }
  func.func @transform_2(%arg0: i32) -> (i32, i32) {
    %c0_i32 = arith.constant 0 : i32
    %c0_i32_0 = arith.constant 0 : i32
    %c0_i32_1 = arith.constant 0 : i32
    return %c0_i32, %c0_i32_0 : i32, i32
  }
  func.func @transform_3(%arg0: i32) -> (i32, i32) {
    %c0_i32 = arith.constant 0 : i32
    %c0_i32_0 = arith.constant 0 : i32
    %c0_i32_1 = arith.constant 0 : i32
    return %c0_i32, %c0_i32_0 : i32, i32
  }
  func.func @transform_4(%arg0: i32) -> (i32, i32) {
    %c0_i32 = arith.constant 0 : i32
    %c0_i32_0 = arith.constant 0 : i32
    %c0_i32_1 = arith.constant 0 : i32
    return %c0_i32, %c0_i32_0 : i32, i32
  }
  func.func @transform_5(%arg0: i32) -> (i32, i32) {
    %c0_i32 = arith.constant 0 : i32
    %c0_i32_0 = arith.constant 0 : i32
    %c0_i32_1 = arith.constant 0 : i32
    return %c0_i32, %c0_i32_0 : i32, i32
  }
  func.func @transform_6(%arg0: i32) -> (i32, i32) {
    %c0_i32 = arith.constant 0 : i32
    %c0_i32_0 = arith.constant 0 : i32
    %c0_i32_1 = arith.constant 0 : i32
    return %c0_i32, %c0_i32_0 : i32, i32
  }
  func.func @transform_7(%arg0: i32) -> (i32, i32) {
    %c0_i32 = arith.constant 0 : i32
    %c0_i32_0 = arith.constant 0 : i32
    %c0_i32_1 = arith.constant 0 : i32
    return %c0_i32, %c0_i32_0 : i32, i32
  }
  func.func @transform_8(%arg0: i32) -> (i32, i32) {
    %c0_i32 = arith.constant 0 : i32
    %c0_i32_0 = arith.constant 0 : i32
    %c0_i32_1 = arith.constant 0 : i32
    return %c0_i32, %c0_i32_0 : i32, i32
  }
  func.func @transform_9(%arg0: i32) -> (i32, i32) {
    %c0_i32 = arith.constant 0 : i32
    %c0_i32_0 = arith.constant 0 : i32
    %c0_i32_1 = arith.constant 0 : i32
    return %c0_i32, %c0_i32_0 : i32, i32
  }
  func.func @transform_10(%arg0: i32) -> (i32, i32) {
    %c0_i32 = arith.constant 0 : i32
    %c0_i32_0 = arith.constant 0 : i32
    %c0_i32_1 = arith.constant 0 : i32
    return %c0_i32, %c0_i32_0 : i32, i32
  }
  func.func @transform_11(%arg0: i32) -> (i32, i32) {
    %c0_i32 = arith.constant 0 : i32
    %c0_i32_0 = arith.constant 0 : i32
    %c0_i32_1 = arith.constant 0 : i32
    return %c0_i32, %c0_i32_0 : i32, i32
  }
  func.func @transform_12(%arg0: i32) -> (i32, i32) {
    %c0_i32 = arith.constant 0 : i32
    %c0_i32_0 = arith.constant 0 : i32
    %c0_i32_1 = arith.constant 0 : i32
    return %c0_i32, %c0_i32_0 : i32, i32
  }
  func.func @transform_13(%arg0: i32) -> (i32, i32) {
    %c0_i32 = arith.constant 0 : i32
    %c0_i32_0 = arith.constant 0 : i32
    %c0_i32_1 = arith.constant 0 : i32
    return %c0_i32, %c0_i32_0 : i32, i32
  }
  func.func @transform_14(%arg0: i32) -> (i32, i32) {
    %c0_i32 = arith.constant 0 : i32
    %c0_i32_0 = arith.constant 0 : i32
    %c0_i32_1 = arith.constant 0 : i32
    return %c0_i32, %c0_i32_0 : i32, i32
  }
  func.func @transform_15(%arg0: i32) -> (i32, i32) {
    %c0_i32 = arith.constant 0 : i32
    %c0_i32_0 = arith.constant 0 : i32
    %c0_i32_1 = arith.constant 0 : i32
    return %c0_i32, %c0_i32_0 : i32, i32
  }
  func.func @transform_16(%arg0: i32) -> (i32, i32) {
    %c0_i32 = arith.constant 0 : i32
    %c0_i32_0 = arith.constant 0 : i32
    %c0_i32_1 = arith.constant 0 : i32
    return %c0_i32, %c0_i32_0 : i32, i32
  }
  func.func @transform_17(%arg0: i32) -> (i32, i32) {
    %c0_i32 = arith.constant 0 : i32
    %c0_i32_0 = arith.constant 0 : i32
    return %arg0, %c0_i32 : i32, i32
  }
}

</mosaic_0001>

<bundles_post_ra>
// kernel: tpu_custom_call.1
= control target key start
LH: loop header
LB: loop body
LE: loop exit
PB: predicated region body
PF: predicated region fallthrough
CT: control target
= control target key end

     0   :  { %s2465_s0 = inlined_call_operand.vmem [shape: f32[64,64], index: 0, kind: input, shape index: {}]   ;;  %s2466_s1 = inlined_call_operand.vmem [shape: f32[64,64], index: 1, kind: input, shape index: {}]   ;;  %s2467_s2 = inlined_call_operand.vmem [shape: f32[1,128], index: 2, kind: input, shape index: {}]   ;;  %s2468_s3 = inlined_call_operand.vmem [shape: f32[1,128], index: 3, kind: input, shape index: {}]   ;;  %s2469_s4 = inlined_call_operand.vmem [shape: bf16[16,32], index: 4, kind: input, shape index: {}]   ;;  %s2470_s5 = inlined_call_operand.vmem [shape: f32[16,1], index: 5, kind: input, shape index: {}]   ;;  %s2471_s6 = inlined_call_operand.vmem [shape: bf16[32,16], index: 6, kind: input, shape index: {}]   ;;  %s2472_s7 = inlined_call_operand.vmem [shape: f32[32,1], index: 7, kind: input, shape index: {}]   ;;  %s2473_s8 = inlined_call_operand.vmem [shape: f32[1,128], index: 8, kind: input, shape index: {}]   ;;  %s2474_s9 = inlined_call_operand.vmem [shape: f32[1,128], index: 9, kind: input, shape index: {}]   ;;  %s2475_s10 = inlined_call_operand.vmem [shape: bf16[128,64], index: 10, kind: input, shape index: {}]   ;;  %s2476_s11 = inlined_call_operand.vmem [shape: f32[1,64], index: 11, kind: input, shape index: {}]   ;;  %s2477_s12 = inlined_call_operand.vmem [shape: bf16[64,128], index: 12, kind: input, shape index: {}]   ;;  %s2478_s13 = inlined_call_operand.vmem [shape: f32[1,128], index: 13, kind: input, shape index: {}]   ;;  %s2479_s14 = inlined_call_operand.vmem [shape: f32[1,128], index: 14, kind: input, shape index: {}]   ;;  %s2480_s15 = inlined_call_operand.vmem [shape: f32[1,128], index: 15, kind: input, shape index: {}]   ;;  %s2481_s16 = inlined_call_operand.vmem [shape: bf16[128,64], index: 16, kind: input, shape index: {}]   ;;  %s2482_s17 = inlined_call_operand.hbm [shape: f32[64,64], index: 17, kind: output, shape index: {}]  }
   0x1   :  { %2488 = sst [smem:[#allocation11_spill]] %s2465_s0 }
   0x2   :  { %2489 = sst [smem:[#allocation12_spill]] %s2466_s1 }
   0x3   :  { %2490 = sst [smem:[#allocation13_spill]] %s2467_s2 }
   0x4   :  { %2491 = sst [smem:[#allocation14_spill]] %s2468_s3 }
   0x5   :  { %22 = vsyncpa [#allocation4], 0 }
   0x6   :  { %24 = vsyncpa [#allocation4 + $0x1], 0  ;;  %s2046_s24 = smov 0   ;;  %s2048_s25 = smov 0  }
   0x7   :  { %s2050_s26 = smov 0   ;;  %s2052_s27 = smov 0  }
   0x8 LB: > { %2492 = sst [smem:[#allocation6_spill]] %s1936_s24  ;;  %s2067_s28 = sadd.s32 4294967295, %s1948_s27   ;;  %s1948_s27 = sphi %s2052_s27, %s2505_s27   ;;  %s1944_s26 = sphi %s2050_s26, %s2507_s26   ;;  %s1940_s25 = sphi %s2048_s25, %s2509_s25   ;;  %s1936_s24 = sphi %s2046_s24, %s2508_s24  }
   0x9   : > { %2493 = sst [smem:[#allocation7_spill]] %s1944_s26  ;;  %s1633_s29 = sadd.s32 4294967294, %s1948_s27  }
   0xa   : > { %s2071_s0 = sadd.s32 1, %s1948_s27   ;;  %s404_s30 = sadd.s32 1, %s1944_s26 }
   0xb   : > { %2494 = sst [smem:[#allocation8_spill]] %s2071_s0  ;;  %s401_s18 = ssub.s32 %s1948_s27, %s2071_s0 }
   0xc   : > { %p414_p0 = scmp.ne.s32.totalorder %s1944_s26, %s1940_s25  ;;  %p402_p1 = scmp.eq.s32.totalorder %s401_s18, 0 }
   0xd   : > { %p415_p2 = scmp.eq.s32.totalorder %s2067_s28, 1  ;;  %p420_p3 = scmp.ne.s32.totalorder %s1940_s25, %s1936_s24 }
   0xe   : > { %p421_p4 = scmp.eq.s32.totalorder %s1633_s29, 1  ;;  %p1636_p7 = scmp.ge.s32.totalorder %s1948_s27, 1 }
   0xf   : > { %s2082_s19 = scalar_select %p402_p1, %s1944_s26, %s404_s30  }
  0x10   : > { %p2084_p5 = por %p415_p2, %p414_p0  ;;  %p2088_p6 = por %p421_p4, %p420_p3 }
  0x11   : > { %2495 = sst [smem:[#allocation9_spill]] %s2082_s19  ;;  %p502_p8 = scmp.lt.s32.totalorder %s1948_s27, 3 }
  0x12   : > { %s2497_s20 = scalar_select %p2088_p6, 1, 0 }
  0x13   : > { %p503_p9 = pnand %p1636_p7, %p502_p8 }
  0x14   : > { %2498 = sst [smem:[#allocation10_spill]] %s2497_s20  ;;  %s1638_s21 = sshll.u32 (!%p503_p9), %s2067_s28, 2 }
  0x15   : > { %506 = sbr.rel (%p503_p9) target bundleno = 1912 (0x778), region = 88  ;;  %p560_p10 = scmp.lt.s32.totalorder (!%p503_p9), %s1638_s21, 7 }
  0x16   : > { %s2499_s30 = sld [smem:[#allocation12_spill]] (!%p503_p9)  ;;  %s1950_s19 = smov (!%p503_p9), 64  }
  0x17   : > { %s2500_s20 = sld [smem:[#allocation11_spill]] (!%p503_p9)  ;;  %s1773_s26 = sshll.u32 (!%p503_p9), %s2067_s28, 5 }
  0x18   : > { %s2501_s2 = sld [smem:[#allocation13_spill]] (!%p503_p9)  ;;  %s1906_s0 = scalar_lea.hbm (!%p503_p9), %s2482_s17, 64 }
  0x19   : > { %s2502_s3 = sld [smem:[#allocation14_spill]] (!%p503_p9) }
  0x1a   : > { %s2511_s21 = smov (!%p560_p10, %s1638_s21), 7  ;;  %vm577_vm0 = vcmask 523264   ;;  %vm602_vm1 = vcmask 1048064   ;;  %v1951_v16 = vmov 128.0   ;;  %v719_v62 = vld [vmem:[%s2470_s5 + $0x8] sm:$0xff]  ;;  %v718_v63 = vld [vmem:[%s2470_s5] sm:$0xff] }
  0x1b   : > { %s1639_s22 = sshll.u32 %s2511_s21, 3  ;;  %1848 = vrcp.f32 %v1951_v16  ;;  %vm735_vm15 = vcmask 261120  }
  0x1c   : > { %s569_s18 = scalar_lea.vmem %s2499_s30, %s1639_s22  ;;  %s556_s30 = sand.u32 1, %s1940_s25  }
  0x1d   : > { %v584_v0 = vld [vmem:[%s569_s18 + $0x10] sm:$0xff]  ;;  %v582_v1 = vld [vmem:[%s569_s18] sm:$0xff]  ;;  %v585_v2 = vld [vmem:[%s569_s18 + $0x18] sm:$0xff]  ;;  %s563_s24 = scalar_lea.vmem %s2500_s20, %s1639_s22  ;;  %s1555_s20 = scalar_lea.hbm %s2482_s17, %s1773_s26 }
  0x1e   : > { %594 = vrot.lane.b32.xlu0 %v584_v0, %s1950_s19  ;;  %590 = vrot.lane.b32.xlu1 %v582_v1, %s1950_s19  ;;  %v583_v3 = vld [vmem:[%s569_s18 + $0x8] sm:$0xff]  ;;  %v575_v4 = vld [vmem:[%s563_s24 + $0x10] sm:$0xff]  ;;  %s1637_s18 = sshll.u32 %s556_s30, 5  ;;  %s1558_s22 = sshll.u32 %s1555_s20, 4  ;;  %s1559_s22 = int_to_ptr.hbm [resolvable:$true] %s1558_s22 }
  0x1f   : > { %v573_v5 = vld [vmem:[%s563_s24] sm:$0xff]  ;;  %580 = vst.msk [vmem:[#allocation2 + $0x10] sm:$0xff] %vm577_vm0, %v575_v4  ;;  %v576_v6 = vld [vmem:[%s563_s24 + $0x18] sm:$0xff]  ;;  %v574_v7 = vld [vmem:[%s563_s24 + $0x8] sm:$0xff]  ;;  %v1952_v4 = vmov 0   ;;  %s1953_s24 = smov 127  }
  0x20   : > { %578 = vst.msk [vmem:[#allocation2] sm:$0xff] %vm577_vm0, %v573_v5  ;;  %1828 = vset.pattern.permute.xlu0 %v1952_v4  ;;  %1827 = vset.pattern.permute.xlu2 %v1952_v4  ;;  %s1544_s23 = scalar_lea.sflag [#allocation4], %s556_s30  ;;  %s1900_s28 = sshra.s32 %s1559_s22, 4  ;;  %s1901_s28 = int_to_ptr.hbm [resolvable:$true] %s1900_s28 }
  0x21   : > { %581 = vst.msk [vmem:[#allocation2 + $0x18] sm:$0xff] %vm577_vm0, %v576_v6  ;;  %v1849_v17 = vpop.eup %1848  ;;  %1829 = vset.pattern.permute.xlu1 %v1952_v4  ;;  %s1902_s29 = scalar_lea.hbm %s1901_s28, 32  ;;  %p1907_p0 = scmp.lt.s32.totalorder %s1901_s28, %s2482_s17 }
  0x22   : > { %579 = vst.msk [vmem:[#allocation2 + $0x8] sm:$0xff] %vm577_vm0, %v574_v7  ;;  %v622_v18 = vmul.f32 128.0, %v1849_v17  ;;  %vm626_vm2 = vweird.f32 %v1849_v17  ;;  %p1903_p11 = scmp.ne.s32.totalorder %s1901_s28, %s1902_s29  ;;  %p1908_p1 = scmp.lt.s32.totalorder %s1906_s0, %s1902_s29 }
  0x24   : > { %v623_v19 = vsub.f32 1.0, %v622_v18  ;;  %v887_v18 = vld [vmem:[%s2472_s7 + $0x8] sm:$0xff]  ;;  %p1904_p12 = pnand %p1903_p11, %p2084_p5  ;;  %p1909_p2 = por %p1908_p1, %p1907_p0 }
  0x26   : > { %596 = vrot.lane.b32.xlu0 %v585_v2, %s1950_s19  ;;  %592 = vrot.lane.b32.xlu1 %v583_v3, %s1950_s19  ;;  %v624_v20 = vmul.f32 %v1849_v17, %v623_v19  ;;  %v1840_v3 = vld [vmem:[%s2501_s2] ss:$0 sm:$0xff]  ;;  %p1905_p13 = pneg %p1904_p12 }
  0x28   : > { %v625_v21 = vadd.f32 %v1849_v17, %v624_v20  ;;  %p1910_p3 = pnand %p1909_p2, %p1905_p13 }
  0x2a   : > { %v2117_v22 = vsel %vm626_vm2, %v1849_v17, %v625_v21 }
  0x90   : > { %v595_v8 = vpop.permute.xlu0 %594  ;;  %v591_v9 = vpop.permute.xlu1 %590 }
  0x91   : > { %605 = vst.msk [vmem:[#allocation2 + $0x10] sm:$0xff] %vm602_vm1, %v595_v8 }
  0x92   : > { %603 = vst.msk [vmem:[#allocation2] sm:$0xff] %vm602_vm1, %v591_v9 }
  0x98   : > { %v597_v10 = vpop.permute.xlu0 %596  ;;  %v593_v11 = vpop.permute.xlu1 %592  ;;  %v2105_v12 = vld [vmem:[#allocation2 + $0x10] sm:$0xff] }
  0x99   : > { %606 = vst.msk [vmem:[#allocation2 + $0x18] sm:$0xff] %vm602_vm1, %v597_v10  ;;  %617 = vadd.xlane.f32.xlu2 %v2105_v12  ;;  %v2108_v13 = vld [vmem:[#allocation2] sm:$0xff] }
  0x9a   : > { %604 = vst.msk [vmem:[#allocation2 + $0x8] sm:$0xff] %vm602_vm1, %v593_v11  ;;  %613 = vadd.xlane.f32.xlu0 %v2108_v13  ;;  %v1841_v11 = vld [vmem:[%s2502_s3] ss:$0 sm:$0xff] }
  0xa0   : > { %v2111_v14 = vld [vmem:[#allocation2 + $0x18] sm:$0xff] }
  0xa1   : > { %619 = vadd.xlane.f32.xlu2 %v2111_v14  ;;  %v2114_v15 = vld [vmem:[#allocation2 + $0x8] sm:$0xff] }
  0xa2   : > { %615 = vadd.xlane.f32.xlu1 %v2114_v15 }
  0xae   : > { %727 = vperm.xlu0 %1828, %v719_v62  }
 0x10c   : > { %v618_v23 = vpop.xlane.xlu2 %617 }
 0x10d   : > { %v630_v24 = vmul.f32 %v2117_v22, %v618_v23  ;;  %v614_v29 = vpop.xlane.xlu0 %613 }
 0x10e   : > { %v628_v31 = vmul.f32 %v2117_v22, %v614_v29 }
 0x10f   : > { %v634_v25 = vsub.f32 %v2105_v12, %v630_v24 }
 0x110   : > { %v2125_v33 = vsub.f32 %v2108_v13, %v628_v31 }
 0x111   : > { %v638_v26 = vmul.f32 %v634_v25, %v634_v25 }
 0x112   : > { %v636_v36 = vmul.f32 %v2125_v33, %v2125_v33 }
 0x113   : > { %644 = vadd.xlane.f32.xlu2 %v638_v26 }
 0x114   : > { %v620_v27 = vpop.xlane.xlu2 %619 }
 0x115   : > { %v631_v28 = vmul.f32 %v2117_v22, %v620_v27  ;;  %v616_v34 = vpop.xlane.xlu1 %615 }
 0x116   : > { %v629_v35 = vmul.f32 %v2117_v22, %v616_v34 }
 0x117   : > { %v635_v30 = vsub.f32 %v2111_v14, %v631_v28 }
 0x118   : > { %v2131_v37 = vsub.f32 %v2114_v15, %v629_v35 }
 0x119   : > { %v639_v32 = vmul.f32 %v635_v30, %v635_v30 }
 0x11a   : > { %v637_v38 = vmul.f32 %v2131_v37, %v2131_v37 }
 0x11b   : > { %646 = vadd.xlane.f32.xlu2 %v639_v32 }
 0x123   : > { %640 = vadd.xlane.f32.xlu2 %v636_v36 }
 0x12b   : > { %642 = vadd.xlane.f32.xlu2 %v637_v38 }
 0x143   : > { %722 = vperm.xlu2 %1827, %v718_v63  }
 0x14b   : > { %897 = vperm.xlu2 %1827, %v887_v18  }
 0x186   : > { %v645_v39 = vpop.xlane.xlu2 %644 }
 0x187   : > { %v650_v40 = vmul.f32 %v645_v39, %v2117_v22 }
 0x189   : > { %v654_v41 = vadd.f32 1e-05, %v650_v40 }
 0x18b   : > { %1850 = vrsqrt.f32 %v654_v41  ;;  %vm682_vm4 = vweird.f32 %v654_v41 }
 0x18e   : > { %v647_v42 = vpop.xlane.xlu2 %646 }
 0x18f   : > { %v651_v43 = vmul.f32 %v647_v42, %v2117_v22 }
 0x191   : > { %v1851_v44 = vpop.eup %1850  ;;  %v655_v45 = vadd.f32 1e-05, %v651_v43  ;;  %v1750_v43 = vld [vmem:[%s2469_s4] sm:$0xff] }
 0x192   : > { %v677_v46 = vmul.f32 %v1851_v44, %v654_v41  ;;  %vm683_vm3 = vweird.f32 %v1851_v44 }
 0x193   : > { %1852 = vrsqrt.f32 %v655_v45  ;;  %vm684_vm5 = vmor %vm682_vm4, %vm683_vm3  ;;  %vm692_vm7 = vweird.f32 %v655_v45 }
 0x194   : > { %v678_v47 = vmul.f32 %v1851_v44, %v677_v46 }
 0x196   : > { %v679_v48 = vmul.f32 0.5, %v678_v47  ;;  %v641_v49 = vpop.xlane.xlu2 %640  ;;  %v728_v47 = vpop.permute.xlu0 %727 }
 0x197   : > { %v648_v50 = vmul.f32 %v641_v49, %v2117_v22 }
 0x198   : > { %v680_v51 = vsub.f32 1.5, %v679_v48 }
 0x199   : > { %v1853_v52 = vpop.eup %1852  ;;  %v652_v53 = vadd.f32 1e-05, %v648_v50 }
 0x19a   : > { %v681_v54 = vmul.f32 %v1851_v44, %v680_v51  ;;  %v687_v55 = vmul.f32 %v1853_v52, %v655_v45  ;;  %vm693_vm6 = vweird.f32 %v1853_v52 }
 0x19b   : > { %1854 = vrsqrt.f32 %v652_v53  ;;  %vm694_vm8 = vmor %vm692_vm7, %vm693_vm6  ;;  %vm662_vm10 = vweird.f32 %v652_v53 }
 0x19c   : > { %v688_v56 = vmul.f32 %v1853_v52, %v687_v55  ;;  %v685_v59 = vsel %vm684_vm5, %v1851_v44, %v681_v54 }
 0x19d   : > { %v698_v2 = vmul.f32 %v685_v59, %v634_v25 }
 0x19e   : > { %v689_v57 = vmul.f32 0.5, %v688_v56  ;;  %v643_v58 = vpop.xlane.xlu2 %642 }
 0x19f   : > { %v649_v60 = vmul.f32 %v643_v58, %v2117_v22  ;;  %v705_v10 = vmul.f32 %v1840_v3, %v698_v2 }
 0x1a0   : > { %v690_v61 = vsub.f32 1.5, %v689_v57 }
 0x1a1   : > { %v1855_v0 = vpop.eup %1854  ;;  %v653_v1 = vadd.f32 1e-05, %v649_v60  ;;  %v712_v21 = vadd.f32 %v1841_v11, %v705_v10 }
 0x1a2   : > { %v691_v5 = vmul.f32 %v1853_v52, %v690_v61  ;;  %v657_v6 = vmul.f32 %v1855_v0, %v652_v53  ;;  %vm663_vm9 = vweird.f32 %v1855_v0 }
 0x1a3   : > { %1856 = vrsqrt.f32 %v653_v1  ;;  %vm664_vm11 = vmor %vm662_vm10, %vm663_vm9  ;;  %vm672_vm13 = vweird.f32 %v653_v1  ;;  %vm856_vm9 = vcmask 130048  }
 0x1a4   : > { %v658_v7 = vmul.f32 %v1855_v0, %v657_v6  ;;  %v695_v8 = vsel %vm694_vm8, %v1853_v52, %v691_v5 }
 0x1a5   : > { %v699_v9 = vmul.f32 %v695_v8, %v635_v30  ;;  %v888_v30 = vld [vmem:[%s2472_s7 + $0x10] sm:$0xff] }
 0x1a6   : > { %v659_v16 = vmul.f32 0.5, %v658_v7  ;;  %902 = vperm.xlu2 %1827, %v888_v30   ;;  %v886_v30 = vld [vmem:[%s2472_s7] sm:$0xff] }
 0x1a7   : > { %v706_v17 = vmul.f32 %v1840_v3, %v699_v9  ;;  %892 = vperm.xlu1 %1829, %v886_v30  }
 0x1a8   : > { %v660_v19 = vsub.f32 1.5, %v659_v16 }
 0x1a9   : > { %v1857_v20 = vpop.eup %1856  ;;  %v713_v23 = vadd.f32 %v1841_v11, %v706_v17 }
 0x1aa   : > { %v661_v24 = vmul.f32 %v1855_v0, %v660_v19  ;;  %v667_v25 = vmul.f32 %v1857_v20, %v653_v1  ;;  %vm673_vm12 = vweird.f32 %v1857_v20 }
 0x1ab   : > { %v717_v26 = vpack.c.bf16 %v713_v23, %v712_v21  ;;  %vm674_vm14 = vmor %vm672_vm13, %vm673_vm12 }
 0x1ac   : > { %v668_v27 = vmul.f32 %v1857_v20, %v667_v25  ;;  %v665_v29 = vsel %vm664_vm11, %v1855_v0, %v661_v24 }
 0x1ad   : > { %745 = vmatpush.bf16.msra.mxu0 %v717_v26  ;;  %v696_v32 = vmul.f32 %v665_v29, %v2125_v33  ;;  %v723_v33 = vpop.permute.xlu2 %722 }
 0x1ae   : > { %v669_v28 = vmul.f32 0.5, %v668_v27 }
 0x1af   : > { %v703_v38 = vmul.f32 %v1840_v3, %v696_v32 }
 0x1b0   : > { %v670_v31 = vsub.f32 1.5, %v669_v28 }
 0x1b1   : > { %v710_v40 = vadd.f32 %v1841_v11, %v703_v38 }
 0x1b2   : > { %v671_v34 = vmul.f32 %v1857_v20, %v670_v31 }
 0x1b4   : > { %v675_v35 = vsel %vm674_vm14, %v1857_v20, %v671_v34 }
 0x1b5   : > { %v697_v36 = vmul.f32 %v675_v35, %v2131_v37 }
 0x1b7   : > { %v704_v39 = vmul.f32 %v1840_v3, %v697_v36 }
 0x1b9   : > { %v711_v41 = vadd.f32 %v1841_v11, %v704_v39 }
 0x1bb   : > { %v716_v42 = vpack.c.bf16 %v711_v41, %v710_v40 }
 0x1bd   : > { %746 = vmatpush.bf16.msra.mxu0 %v716_v42 }
 0x1c0   : > { %1646 = vmatmul.msk.bf16.vlgmr.msra.gmra.mxu0 %vm735_vm15, %v1750_v43 }
 0x23d   : > { %v748_v44 = vpop.f32.mrf.mxu0 }
 0x23e   : > { %v2163_v45 = vadd.f32 %v748_v44, %v723_v33 }
 0x240   : > { %v2166_v46 = vmul.f32 0.70710677, %v2163_v45 }
 0x242   : > { %v757_v37 = vmul.f32 %v2166_v46, %v2166_v46 }
 0x244   : > { %v758_v48 = vmin.f32 %v757_v37, 16.0 }
 0x245   : > { %v750_v49 = vpop.f32.mrf.mxu0 }
 0x246   : > { %v759_v50 = vmul.f32 2.1237322e-06, %v758_v48  ;;  %v2170_v51 = vadd.f32 %v750_v49, %v728_v47  ;;  %v770_v52 = vmul.f32 3.8918573e-05, %v758_v48 }
 0x248   : > { %v760_v53 = vadd.f32 0.00028619796, %v759_v50  ;;  %v2173_v54 = vmul.f32 0.70710677, %v2170_v51  ;;  %v771_v55 = vadd.f32 0.001143296, %v770_v52 }
 0x24a   : > { %v797_v56 = vmul.f32 %v2173_v54, %v2173_v54  ;;  %v761_v57 = vmul.f32 %v760_v53, %v758_v48  ;;  %v772_v58 = vmul.f32 %v771_v55, %v758_v48 }
 0x24c   : > { %v798_v59 = vmin.f32 %v797_v56, 16.0  ;;  %v773_v60 = vadd.f32 0.014752088, %v772_v58  ;;  %v762_v63 = vadd.f32 0.0036580483, %v761_v57 }
 0x24e   : > { %v799_v61 = vmul.f32 2.1237322e-06, %v798_v59  ;;  %v810_v62 = vmul.f32 3.8918573e-05, %v798_v59  ;;  %v774_v0 = vmul.f32 %v773_v60, %v758_v48  ;;  %v763_v6 = vmul.f32 %v762_v63, %v758_v48  ;;  %v889_v60 = vld [vmem:[%s2472_s7 + $0x18] sm:$0xff] }
 0x24f   : > { %907 = vperm.xlu1 %1829, %v889_v60  }
 0x250   : > { %v800_v1 = vadd.f32 0.00028619796, %v799_v61  ;;  %v811_v2 = vadd.f32 0.001143296, %v810_v62  ;;  %v775_v3 = vadd.f32 0.112945676, %v774_v0 }
 0x251   : > { %v764_v16 = vadd.f32 0.05243302, %v763_v6 }
 0x252   : > { %v801_v4 = vmul.f32 %v800_v1, %v798_v59  ;;  %v812_v5 = vmul.f32 %v811_v2, %v798_v59  ;;  %v776_v7 = vmul.f32 %v775_v3, %v758_v48  ;;  %v753_v3 = vmul.f32 0.5, %v2163_v45  ;;  %v893_v45 = vpop.permute.xlu1 %892 }
 0x253   : > { %v765_v23 = vmul.f32 %v764_v16, %v758_v48  ;;  %v898_v16 = vpop.permute.xlu2 %897 }
 0x254   : > { %v802_v8 = vadd.f32 0.0036580483, %v801_v4  ;;  %v813_v9 = vadd.f32 0.014752088, %v812_v5  ;;  %v777_v10 = vadd.f32 0.4994258, %v776_v7 }
 0x255   : > { %v766_v27 = vadd.f32 0.18741608, %v765_v23  ;;  %v754_v4 = vmul.f32 0.5, %v2170_v51 }
 0x256   : > { %v814_v11 = vmul.f32 %v813_v9, %v798_v59  ;;  %v778_v17 = vmul.f32 %v777_v10, %v758_v48  ;;  %v803_v18 = vmul.f32 %v802_v8, %v798_v59  ;;  %v1752_v9 = vld [vmem:[%s2471_s6 + $0x8] sm:$0xff] }
 0x257   : > { %v767_v34 = vmul.f32 %v766_v27, %v758_v48 }
 0x258   : > { %v815_v19 = vadd.f32 0.112945676, %v814_v11  ;;  %v779_v20 = vadd.f32 1.0, %v778_v17  ;;  %v804_v24 = vadd.f32 0.05243302, %v803_v18 }
 0x259   : > { %v768_v41 = vadd.f32 1.1283791, %v767_v34 }
 0x25a   : > { %v816_v21 = vmul.f32 %v815_v19, %v798_v59  ;;  %1858 = vrcp.f32 %v779_v20  ;;  %v805_v28 = vmul.f32 %v804_v24, %v798_v59  ;;  %v791_v38 = vand.u32 2147483648, %v779_v20 }
 0x25b   : > { %v789_v40 = vand.u32 2147483647, %v779_v20  ;;  %vm785_vm2 = vweird.f32 %v779_v20  ;;  %v769_v49 = vmul.f32 %v768_v41, %v2166_v46  ;;  %v903_v23 = vpop.permute.xlu2 %902 }
 0x25c   : > { %v817_v25 = vadd.f32 0.4994258, %v816_v21  ;;  %v806_v35 = vadd.f32 0.18741608, %v805_v28  ;;  %v792_v44 = vor.u32 1.1754944e-38, %v791_v38 }
 0x25d   : > { %vm790_vm4 = vcmp.eq.f32.partialorder %v789_v40, 8.507059e+37 }
 0x25e   : > { %v818_v26 = vmul.f32 %v817_v25, %v798_v59  ;;  %v807_v43 = vmul.f32 %v806_v35, %v798_v59 }
 0x260   : > { %v819_v29 = vadd.f32 1.0, %v818_v26  ;;  %v1859_v31 = vpop.eup %1858  ;;  %v808_v52 = vadd.f32 1.1283791, %v807_v43  ;;  %v1760_v43 = vld [vmem:[%s2475_s10 + $0x38] sm:$0xff] }
 0x261   : > { %v781_v32 = vmul.f32 %v1859_v31, %v779_v20  ;;  %vm786_vm1 = vweird.f32 %v1859_v31  ;;  %1080 = vmatpush.bf16.msra.mxu2 %v1760_v43 }
 0x262   : > { %1860 = vrcp.f32 %v819_v29  ;;  %vm787_vm3 = vmor %vm785_vm2, %vm786_vm1  ;;  %v831_v53 = vand.u32 2147483648, %v819_v29  ;;  %v829_v57 = vand.u32 2147483647, %v819_v29  ;;  %vm825_vm6 = vweird.f32 %v819_v29 }
 0x263   : > { %v782_v36 = vsub.f32 1.0, %v781_v32  ;;  %v809_v61 = vmul.f32 %v808_v52, %v2173_v54  ;;  %v1751_v54 = vld [vmem:[%s2471_s6] sm:$0xff] }
 0x264   : > { %v832_v59 = vor.u32 1.1754944e-38, %v831_v53  ;;  %vm830_vm8 = vcmp.eq.f32.partialorder %v829_v57, 8.507059e+37 }
 0x265   : > { %v783_v39 = vmul.f32 %v1859_v31, %v782_v36 }
 0x267   : > { %v784_v33 = vadd.f32 %v1859_v31, %v783_v39 }
 0x268   : > { %v1861_v42 = vpop.eup %1860 }
 0x269   : > { %v821_v37 = vmul.f32 %v1861_v42, %v819_v29  ;;  %v788_v47 = vsel %vm787_vm3, %v1859_v31, %v784_v33  ;;  %vm826_vm5 = vweird.f32 %v1861_v42  ;;  %v1759_v33 = vld [vmem:[%s2475_s10 + $0x30] sm:$0xff] }
 0x26a   : > { %v793_v50 = vsel %vm790_vm4, %v792_v44, %v788_v47  ;;  %vm827_vm7 = vmor %vm825_vm6, %vm826_vm5  ;;  %1081 = vmatpush.bf16.msra.mxu2 %v1759_v33  ;;  %v1758_v44 = vld [vmem:[%s2475_s10 + $0x28] sm:$0xff]  ;;  %v1756_v47 = vld [vmem:[%s2475_s10 + $0x18] sm:$0xff] }
 0x26b   : > { %v822_v48 = vsub.f32 1.0, %v821_v37  ;;  %v794_v55 = vmul.f32 %v793_v50, %v769_v49  ;;  %v1757_v37 = vld [vmem:[%s2475_s10 + $0x20] sm:$0xff]  ;;  %v1755_v49 = vld [vmem:[%s2475_s10 + $0x10] sm:$0xff]  ;;  %v1754_v50 = vld [vmem:[%s2475_s10 + $0x8] sm:$0xff] }
 0x26d   : > { %v823_v56 = vmul.f32 %v1861_v42, %v822_v48  ;;  %v1647_v62 = vclamps-f32 %v794_v55, 1.0  ;;  %v1753_v55 = vld [vmem:[%s2475_s10] sm:$0xff] }
 0x26e   : > { %1082 = vmatpush.bf16.msra.mxu2 %v1758_v44 }
 0x26f   : > { %v824_v58 = vadd.f32 %v1861_v42, %v823_v56  ;;  %v837_v2 = vadd.f32 1.0, %v1647_v62 }
 0x271   : > { %v828_v46 = vsel %vm827_vm7, %v1861_v42, %v824_v58  ;;  %v839_v6 = vmul.f32 %v837_v2, %v753_v3 }
 0x272   : > { %v833_v63 = vsel %vm830_vm8, %v832_v59, %v828_v46  ;;  %1083 = vmatpush.bf16.msra.mxu2 %v1757_v37 }
 0x273   : > { %v834_v0 = vmul.f32 %v833_v63, %v809_v61 }
 0x275   : > { %v1648_v1 = vclamps-f32 %v834_v0, 1.0 }
 0x276   : > { %1084 = vmatpush.bf16.msra.mxu2 %v1756_v47 }
 0x277   : > { %v838_v5 = vadd.f32 1.0, %v1648_v1 }
 0x279   : > { %v840_v7 = vmul.f32 %v838_v5, %v754_v4 }
 0x27a   : > { %1085 = vmatpush.bf16.msra.mxu2 %v1755_v49 }
 0x27b   : > { %v845_v8 = vpack.c.bf16 %v840_v7, %v839_v6 }
 0x27d   : > { %870 = vmatpush.bf16.msra.mxu1 %v845_v8 }
 0x27e   : > { %1086 = vmatpush.bf16.msra.mxu2 %v1754_v50 }
 0x280   : > { %1657 = vmatmul.msk.bf16.vlgmr.msra.gmra.mxu1 %vm856_vm9, %v1751_v54 }
 0x282   : > { %1087 = vmatpush.bf16.msra.mxu2 %v1753_v55 }
 0x290   : > { %1658 = vmatmul.msk.bf16.gmra.mxu1 %vm856_vm9, %v1752_v9 }
 0x2c1   : > { %v908_v26 = vpop.permute.xlu1 %907 }
 0x2fd   : > { %v872_v10 = vpop.f32.mrf.mxu1 }
 0x2fe   : > { %v882_v51 = vadd.f32 %v872_v10, %v2108_v13 }
 0x300   : > { %v2194_v11 = vadd.f32 %v893_v45, %v882_v51 }
 0x302   : > { %916 = vadd.xlane.f32.xlu2 %v2194_v11 }
 0x305   : > { %v874_v17 = vpop.f32.mrf.mxu1 }
 0x306   : > { %v883_v18 = vadd.f32 %v874_v17, %v2114_v15 }
 0x308   : > { %v2198_v19 = vadd.f32 %v898_v16, %v883_v18  ;;  %v1842_v16 = vld [vmem:[%s2473_s8] ss:$0 sm:$0xff] }
 0x30a   : > { %918 = vadd.xlane.f32.xlu1 %v2198_v19 }
 0x30d   : > { %v877_v20 = vpop.f32.mrf.mxu1 }
 0x30e   : > { %v884_v21 = vadd.f32 %v877_v20, %v2105_v12 }
 0x310   : > { %v2202_v24 = vadd.f32 %v903_v23, %v884_v21 }
 0x312   : > { %920 = vadd.xlane.f32.xlu0 %v2202_v24 }
 0x315   : > { %v879_v13 = vpop.f32.mrf.mxu1 }
 0x316   : > { %v885_v25 = vadd.f32 %v879_v13, %v2111_v14 }
 0x318   : > { %v2206_v27 = vadd.f32 %v908_v26, %v885_v25  ;;  %v1843_v25 = vld [vmem:[%s2474_s9] ss:$0 sm:$0xff] }
 0x31a   : > { %922 = vadd.xlane.f32.xlu2 %v2206_v27 }
 0x375   : > { %v917_v15 = vpop.xlane.xlu2 %916 }
 0x376   : > { %v924_v28 = vmul.f32 %v917_v15, %v2117_v22 }
 0x378   : > { %v2211_v29 = vsub.f32 %v2194_v11, %v924_v28 }
 0x37a   : > { %v932_v12 = vmul.f32 %v2211_v29, %v2211_v29 }
 0x37c   : > { %936 = vadd.xlane.f32.xlu1 %v932_v12 }
 0x37d   : > { %v919_v30 = vpop.xlane.xlu1 %918 }
 0x37e   : > { %v925_v31 = vmul.f32 %v919_v30, %v2117_v22 }
 0x380   : > { %v2217_v14 = vsub.f32 %v2198_v19, %v925_v31 }
 0x382   : > { %v933_v32 = vmul.f32 %v2217_v14, %v2217_v14 }
 0x384   : > { %938 = vadd.xlane.f32.xlu2 %v933_v32 }
 0x385   : > { %v921_v34 = vpop.xlane.xlu0 %920 }
 0x386   : > { %v926_v35 = vmul.f32 %v921_v34, %v2117_v22 }
 0x388   : > { %v2223_v36 = vsub.f32 %v2202_v24, %v926_v35 }
 0x38a   : > { %v934_v38 = vmul.f32 %v2223_v36, %v2223_v36 }
 0x38c   : > { %940 = vadd.xlane.f32.xlu0 %v934_v38 }
 0x38d   : > { %v923_v39 = vpop.xlane.xlu2 %922 }
 0x38e   : > { %v927_v40 = vmul.f32 %v923_v39, %v2117_v22 }
 0x390   : > { %v2229_v41 = vsub.f32 %v2206_v27, %v927_v40 }
 0x392   : > { %v935_v42 = vmul.f32 %v2229_v41, %v2229_v41 }
 0x394   : > { %942 = vadd.xlane.f32.xlu1 %v935_v42 }
 0x3ef   : > { %v937_v48 = vpop.xlane.xlu1 %936 }
 0x3f0   : > { %v944_v52 = vmul.f32 %v937_v48, %v2117_v22  ;;  %v1844_v48 = vld [vmem:[%s2476_s11] ss:$0 sm:$0xff] }
 0x3f2   : > { %v948_v53 = vadd.f32 1e-05, %v944_v52 }
 0x3f4   : > { %1862 = vrsqrt.f32 %v948_v53  ;;  %vm958_vm11 = vweird.f32 %v948_v53 }
 0x3f7   : > { %v939_v56 = vpop.xlane.xlu2 %938 }
 0x3f8   : > { %v945_v57 = vmul.f32 %v939_v56, %v2117_v22 }
 0x3fa   : > { %v1863_v58 = vpop.eup %1862  ;;  %v949_v59 = vadd.f32 1e-05, %v945_v57 }
 0x3fb   : > { %v953_v60 = vmul.f32 %v1863_v58, %v948_v53  ;;  %vm959_vm10 = vweird.f32 %v1863_v58 }
 0x3fc   : > { %1864 = vrsqrt.f32 %v949_v59  ;;  %vm960_vm12 = vmor %vm958_vm11, %vm959_vm10  ;;  %vm968_vm14 = vweird.f32 %v949_v59 }
 0x3fd   : > { %v954_v61 = vmul.f32 %v1863_v58, %v953_v60 }
 0x3ff   : > { %v955_v62 = vmul.f32 0.5, %v954_v61  ;;  %v941_v46 = vpop.xlane.xlu0 %940 }
 0x400   : > { %v946_v63 = vmul.f32 %v941_v46, %v2117_v22 }
 0x401   : > { %v956_v0 = vsub.f32 1.5, %v955_v62 }
 0x402   : > { %v1865_v1 = vpop.eup %1864  ;;  %v950_v2 = vadd.f32 1e-05, %v946_v63 }
 0x403   : > { %v957_v3 = vmul.f32 %v1863_v58, %v956_v0  ;;  %v963_v4 = vmul.f32 %v1865_v1, %v949_v59  ;;  %vm969_vm13 = vweird.f32 %v1865_v1 }
 0x404   : > { %1866 = vrsqrt.f32 %v950_v2  ;;  %vm970_vm15 = vmor %vm968_vm14, %vm969_vm13  ;;  %vm978_vm2 = vweird.f32 %v950_v2 }
 0x405   : > { %v964_v5 = vmul.f32 %v1865_v1, %v963_v4  ;;  %v961_v8 = vsel %vm960_vm12, %v1863_v58, %v957_v3 }
 0x406   : > { %v992_v51 = vmul.f32 %v961_v8, %v2211_v29 }
 0x407   : > { %v965_v6 = vmul.f32 0.5, %v964_v5  ;;  %v943_v7 = vpop.xlane.xlu1 %942 }
 0x408   : > { %v947_v54 = vmul.f32 %v943_v7, %v2117_v22  ;;  %v999_v13 = vmul.f32 %v1842_v16, %v992_v51 }
 0x409   : > { %v966_v9 = vsub.f32 1.5, %v965_v6 }
 0x40a   : > { %v1867_v10 = vpop.eup %1866  ;;  %v951_v45 = vadd.f32 1e-05, %v947_v54  ;;  %v1006_v12 = vadd.f32 %v1843_v25, %v999_v13 }
 0x40b   : > { %v967_v17 = vmul.f32 %v1865_v1, %v966_v9  ;;  %v973_v18 = vmul.f32 %v1867_v10, %v950_v2  ;;  %vm979_vm1 = vweird.f32 %v1867_v10 }
 0x40c   : > { %1868 = vrsqrt.f32 %v951_v45  ;;  %vm980_vm3 = vmor %vm978_vm2, %vm979_vm1  ;;  %vm988_vm5 = vweird.f32 %v951_v45 }
 0x40d   : > { %v974_v20 = vmul.f32 %v1867_v10, %v973_v18  ;;  %v971_v21 = vsel %vm970_vm15, %v1865_v1, %v967_v17 }
 0x40e   : > { %v993_v23 = vmul.f32 %v971_v21, %v2217_v14 }
 0x40f   : > { %v975_v26 = vmul.f32 0.5, %v974_v20 }
 0x410   : > { %v1000_v15 = vmul.f32 %v1842_v16, %v993_v23 }
 0x411   : > { %v976_v28 = vsub.f32 1.5, %v975_v26 }
 0x412   : > { %v1869_v29 = vpop.eup %1868  ;;  %v1007_v30 = vadd.f32 %v1843_v25, %v1000_v15 }
 0x413   : > { %v977_v31 = vmul.f32 %v1867_v10, %v976_v28  ;;  %v983_v32 = vmul.f32 %v1869_v29, %v951_v45  ;;  %vm989_vm4 = vweird.f32 %v1869_v29 }
 0x414   : > { %v1026_v34 = vpack.c.bf16 %v1007_v30, %v1006_v12  ;;  %vm990_vm6 = vmor %vm988_vm5, %vm989_vm4  ;;  %v1763_v12 = vld [vmem:[%s2477_s12 + $0x10] sm:$0xff] }
 0x415   : > { %v984_v35 = vmul.f32 %v1869_v29, %v983_v32  ;;  %v981_v38 = vsel %vm980_vm3, %v1867_v10, %v977_v31 }
 0x416   : > { %1088 = vmatmul.bf16.vlgmr.msra.gmra.mxu2 %v1026_v34  ;;  %v994_v40 = vmul.f32 %v981_v38, %v2223_v36 }
 0x417   : > { %v985_v14 = vmul.f32 0.5, %v984_v35 }
 0x418   : > { %v1001_v44 = vmul.f32 %v1842_v16, %v994_v40  ;;  %v1762_v40 = vld [vmem:[%s2477_s12 + $0x8] sm:$0xff] }
 0x419   : > { %v986_v39 = vsub.f32 1.5, %v985_v14 }
 0x41a   : > { %v1008_v47 = vadd.f32 %v1843_v25, %v1001_v44 }
 0x41b   : > { %v987_v42 = vmul.f32 %v1869_v29, %v986_v39 }
 0x41d   : > { %v991_v43 = vsel %vm990_vm6, %v1869_v29, %v987_v42 }
 0x41e   : > { %v995_v33 = vmul.f32 %v991_v43, %v2229_v41 }
 0x420   : > { %v1002_v37 = vmul.f32 %v1842_v16, %v995_v33  ;;  %v1764_v16 = vld [vmem:[%s2477_s12 + $0x18] sm:$0xff] }
 0x421   : > { %1319 = vmatpush.bf16.msra.mxu3 %v1764_v16 }
 0x422   : > { %v1009_v49 = vadd.f32 %v1843_v25, %v1002_v37 }
 0x424   : > { %v1027_v50 = vpack.c.bf16 %v1009_v49, %v1008_v47 }
 0x425   : > { %1320 = vmatpush.bf16.msra.mxu3 %v1763_v12 }
 0x426   : > { %1093 = vmatmul.bf16.gmra.mxu2 %v1027_v50 }
 0x429   : > { %1321 = vmatpush.bf16.msra.mxu3 %v1762_v40 }
 0x499   : > { %v1089_v52 = vpop.f32.mrf.mxu2 }
 0x49a   : > { %v2274_v53 = vadd.f32 %v1844_v48, %v1089_v52  ;;  %v1761_v52 = vld [vmem:[%s2477_s12] sm:$0xff] }
 0x49b   : > { %1322 = vmatpush.bf16.msra.mxu3 %v1761_v52 }
 0x49c   : > { %v2277_v36 = vmul.f32 0.70710677, %v2274_v53 }
 0x49e   : > { %v1107_v55 = vmul.f32 %v2277_v36, %v2277_v36 }
 0x4a0   : > { %v2281_v41 = vmin.f32 %v1107_v55, 16.0 }
 0x4a1   : > { %v1091_v56 = vpop.f32.mrf.mxu2 }
 0x4a2   : > { %v1109_v57 = vmul.f32 2.1237322e-06, %v2281_v41  ;;  %v1120_v58 = vmul.f32 3.8918573e-05, %v2281_v41  ;;  %v2285_v59 = vadd.f32 %v1844_v48, %v1091_v56 }
 0x4a4   : > { %v1110_v60 = vadd.f32 0.00028619796, %v1109_v57  ;;  %v1121_v61 = vadd.f32 0.001143296, %v1120_v58  ;;  %v2288_v62 = vmul.f32 0.70710677, %v2285_v59 }
 0x4a6   : > { %v1122_v46 = vmul.f32 %v1121_v61, %v2281_v41  ;;  %v1111_v63 = vmul.f32 %v1110_v60, %v2281_v41  ;;  %v1147_v0 = vmul.f32 %v2288_v62, %v2288_v62 }
 0x4a8   : > { %v1123_v1 = vadd.f32 0.014752088, %v1122_v46  ;;  %v2294_v2 = vmin.f32 %v1147_v0, 16.0  ;;  %v1112_v6 = vadd.f32 0.0036580483, %v1111_v63 }
 0x4a9   : > { %v1094_v3 = vpop.f32.mrf.mxu2 }
 0x4aa   : > { %v1124_v4 = vmul.f32 %v1123_v1, %v2281_v41  ;;  %v2297_v5 = vadd.f32 %v1844_v48, %v1094_v3  ;;  %v1149_v7 = vmul.f32 2.1237322e-06, %v2294_v2  ;;  %v1160_v8 = vmul.f32 3.8918573e-05, %v2294_v2 }
 0x4ab   : > { %v1113_v17 = vmul.f32 %v1112_v6, %v2281_v41 }
 0x4ac   : > { %v1125_v54 = vadd.f32 0.112945676, %v1124_v4  ;;  %v1150_v9 = vadd.f32 0.00028619796, %v1149_v7  ;;  %v1161_v10 = vadd.f32 0.001143296, %v1160_v8 }
 0x4ad   : > { %v2302_v45 = vmul.f32 0.70710677, %v2297_v5  ;;  %v1114_v30 = vadd.f32 0.05243302, %v1113_v17 }
 0x4ae   : > { %v1126_v51 = vmul.f32 %v1125_v54, %v2281_v41  ;;  %v1151_v18 = vmul.f32 %v1150_v9, %v2294_v2  ;;  %v1162_v20 = vmul.f32 %v1161_v10, %v2294_v2 }
 0x4af   : > { %v1187_v21 = vmul.f32 %v2302_v45, %v2302_v45  ;;  %v1115_v42 = vmul.f32 %v1114_v30, %v2281_v41 }
 0x4b0   : > { %v1127_v23 = vadd.f32 0.4994258, %v1126_v51  ;;  %v1152_v13 = vadd.f32 0.0036580483, %v1151_v18  ;;  %v1163_v25 = vadd.f32 0.014752088, %v1162_v20 }
 0x4b1   : > { %v2313_v26 = vmin.f32 %v1187_v21, 16.0  ;;  %v1096_v15 = vpop.f32.mrf.mxu2  ;;  %v1116_v55 = vadd.f32 0.18741608, %v1115_v42 }
 0x4b2   : > { %v1128_v28 = vmul.f32 %v1127_v23, %v2281_v41  ;;  %v2316_v29 = vadd.f32 %v1844_v48, %v1096_v15  ;;  %v1153_v31 = vmul.f32 %v1152_v13, %v2294_v2  ;;  %v1164_v32 = vmul.f32 %v1163_v25, %v2294_v2 }
 0x4b3   : > { %v1189_v34 = vmul.f32 2.1237322e-06, %v2313_v26  ;;  %v1200_v14 = vmul.f32 3.8918573e-05, %v2313_v26  ;;  %v1117_v54 = vmul.f32 %v1116_v55, %v2281_v41 }
 0x4b4   : > { %v1129_v35 = vadd.f32 1.0, %v1128_v28  ;;  %v2326_v38 = vmul.f32 0.70710677, %v2316_v29  ;;  %v1165_v39 = vadd.f32 0.112945676, %v1164_v32 }
 0x4b5   : > { %v1154_v43 = vadd.f32 0.05243302, %v1153_v31  ;;  %v1190_v44 = vadd.f32 0.00028619796, %v1189_v34  ;;  %v1201_v37 = vadd.f32 0.001143296, %v1200_v14 }
 0x4b6   : > { %1870 = vrcp.f32 %v1129_v35  ;;  %v1166_v33 = vmul.f32 %v1165_v39, %v2294_v2  ;;  %v1227_v47 = vmul.f32 %v2326_v38, %v2326_v38  ;;  %v1141_v8 = vand.u32 2147483648, %v1129_v35 }
 0x4b7   : > { %v1202_v50 = vmul.f32 %v1201_v37, %v2313_v26  ;;  %v1155_v56 = vmul.f32 %v1154_v43, %v2294_v2  ;;  %v1191_v60 = vmul.f32 %v1190_v44, %v2313_v26  ;;  %v1139_v20 = vand.u32 2147483647, %v1129_v35 }
 0x4b8   : > { %v1167_v49 = vadd.f32 0.4994258, %v1166_v33  ;;  %v2336_v48 = vmin.f32 %v1227_v47, 16.0  ;;  %vm1135_vm8 = vweird.f32 %v1129_v35  ;;  %v1118_v25 = vadd.f32 1.1283791, %v1117_v54 }
 0x4b9   : > { %v1203_v61 = vadd.f32 0.014752088, %v1202_v50  ;;  %v1156_v9 = vadd.f32 0.18741608, %v1155_v56  ;;  %v1192_v10 = vadd.f32 0.0036580483, %v1191_v60 }
 0x4ba   : > { %v1168_v57 = vmul.f32 %v1167_v49, %v2294_v2  ;;  %v1229_v46 = vmul.f32 2.1237322e-06, %v2336_v48  ;;  %v1240_v63 = vmul.f32 3.8918573e-05, %v2336_v48  ;;  %v1142_v31 = vor.u32 1.1754944e-38, %v1141_v8 }
 0x4bb   : > { %v1204_v3 = vmul.f32 %v1203_v61, %v2313_v26  ;;  %v1157_v15 = vmul.f32 %v1156_v9, %v2294_v2  ;;  %v1193_v41 = vmul.f32 %v1192_v10, %v2313_v26  ;;  %vm1140_vm10 = vcmp.eq.f32.partialorder %v1139_v20, 8.507059e+37 }
 0x4bc   : > { %v1871_v58 = vpop.eup %1870  ;;  %v1169_v1 = vadd.f32 1.0, %v1168_v57  ;;  %v1230_v4 = vadd.f32 0.00028619796, %v1229_v46  ;;  %v1241_v6 = vadd.f32 0.001143296, %v1240_v63  ;;  %v1119_v42 = vmul.f32 %v1118_v25, %v2277_v36 }
 0x4bd   : > { %v1131_v0 = vmul.f32 %v1871_v58, %v1129_v35  ;;  %v1205_v51 = vadd.f32 0.112945676, %v1204_v3  ;;  %vm1136_vm7 = vweird.f32 %v1871_v58  ;;  %v1158_v43 = vadd.f32 1.1283791, %v1157_v15 }
 0x4be   : > { %1872 = vrcp.f32 %v1169_v1  ;;  %v1231_v17 = vmul.f32 %v1230_v4, %v2336_v48  ;;  %v1242_v18 = vmul.f32 %v1241_v6, %v2336_v48  ;;  %vm1137_vm9 = vmor %vm1135_vm8, %vm1136_vm7  ;;  %v1194_v2 = vadd.f32 0.05243302, %v1193_v41 }
 0x4bf   : > { %v1132_v7 = vsub.f32 1.0, %v1131_v0  ;;  %v1206_v21 = vmul.f32 %v1205_v51, %v2313_v26  ;;  %v1181_v44 = vand.u32 2147483648, %v1169_v1  ;;  %v1179_v55 = vand.u32 2147483647, %v1169_v1 }
 0x4c0   : > { %v1243_v13 = vadd.f32 0.014752088, %v1242_v18  ;;  %v1232_v32 = vadd.f32 0.0036580483, %v1231_v17  ;;  %vm1175_vm12 = vweird.f32 %v1169_v1  ;;  %v1195_v57 = vmul.f32 %v1194_v2, %v2313_v26 }
 0x4c1   : > { %v1133_v16 = vmul.f32 %v1871_v58, %v1132_v7  ;;  %v1207_v28 = vadd.f32 0.4994258, %v1206_v21  ;;  %v1159_v36 = vmul.f32 %v1158_v43, %v2288_v62  ;;  %v1182_v60 = vor.u32 1.1754944e-38, %v1181_v44 }
 0x4c2   : > { %v1244_v34 = vmul.f32 %v1243_v13, %v2336_v48  ;;  %v1233_v47 = vmul.f32 %v1232_v32, %v2336_v48  ;;  %vm1180_vm14 = vcmp.eq.f32.partialorder %v1179_v55, 8.507059e+37  ;;  %v1196_v6 = vadd.f32 0.18741608, %v1195_v57 }
 0x4c3   : > { %v1134_v23 = vadd.f32 %v1871_v58, %v1133_v16  ;;  %v1208_v40 = vmul.f32 %v1207_v28, %v2313_v26  ;;  %v1099_v62 = vmul.f32 0.5, %v2274_v53  ;;  %v1100_v51 = vmul.f32 0.5, %v2285_v59 }
 0x4c4   : > { %v1873_v12 = vpop.eup %1872  ;;  %v1245_v35 = vadd.f32 0.112945676, %v1244_v34  ;;  %v1234_v61 = vadd.f32 0.05243302, %v1233_v47  ;;  %v1197_v17 = vmul.f32 %v1196_v6, %v2313_v26  ;;  %v1102_v55 = vmul.f32 0.5, %v2316_v29 }
 0x4c5   : > { %v1138_v30 = vsel %vm1137_vm9, %v1871_v58, %v1134_v23  ;;  %v1171_v14 = vmul.f32 %v1873_v12, %v1169_v1  ;;  %v1209_v37 = vadd.f32 1.0, %v1208_v40  ;;  %vm1176_vm11 = vweird.f32 %v1873_v12 }
 0x4c6   : > { %v1143_v39 = vsel %vm1140_vm10, %v1142_v31, %v1138_v30  ;;  %v1246_v49 = vmul.f32 %v1245_v35, %v2336_v48  ;;  %vm1177_vm13 = vmor %vm1175_vm12, %vm1176_vm11  ;;  %v1235_v1 = vmul.f32 %v1234_v61, %v2336_v48  ;;  %v1198_v41 = vadd.f32 1.1283791, %v1197_v17 }
 0x4c7   : > { %v1172_v33 = vsub.f32 1.0, %v1171_v14  ;;  %v1144_v50 = vmul.f32 %v1143_v39, %v1119_v42  ;;  %1874 = vrcp.f32 %v1209_v37  ;;  %v1219_v20 = vand.u32 2147483647, %v1209_v37 }
 0x4c8   : > { %v1247_v58 = vadd.f32 0.4994258, %v1246_v49  ;;  %v1221_v21 = vand.u32 2147483648, %v1209_v37  ;;  %v1236_v23 = vadd.f32 0.18741608, %v1235_v1  ;;  %vm1215_vm1 = vweird.f32 %v1209_v37 }
 0x4c9   : > { %v1173_v52 = vmul.f32 %v1873_v12, %v1172_v33  ;;  %v1691_v46 = vclamps-f32 %v1144_v50, 1.0  ;;  %vm1220_vm3 = vcmp.eq.f32.partialorder %v1219_v20, 8.507059e+37  ;;  %v1199_v34 = vmul.f32 %v1198_v41, %v2302_v45 }
 0x4ca   : > { %v1248_v0 = vmul.f32 %v1247_v58, %v2336_v48  ;;  %v1222_v53 = vor.u32 1.1754944e-38, %v1221_v21  ;;  %v1237_v59 = vmul.f32 %v1236_v23, %v2336_v48 }
 0x4cb   : > { %v1174_v56 = vadd.f32 %v1873_v12, %v1173_v52  ;;  %v1267_v54 = vadd.f32 1.0, %v1691_v46  ;;  %v1101_v52 = vmul.f32 0.5, %v2297_v5 }
 0x4cc   : > { %v1249_v7 = vadd.f32 1.0, %v1248_v0  ;;  %v1238_v39 = vadd.f32 1.1283791, %v1237_v59 }
 0x4cd   : > { %v1178_v63 = vsel %vm1177_vm13, %v1873_v12, %v1174_v56  ;;  %v1875_v8 = vpop.eup %1874  ;;  %v1271_v13 = vmul.f32 %v1267_v54, %v1099_v62 }
 0x4ce   : > { %v1183_v3 = vsel %vm1180_vm14, %v1182_v60, %v1178_v63  ;;  %v1211_v10 = vmul.f32 %v1875_v8, %v1209_v37  ;;  %1876 = vrcp.f32 %v1249_v7  ;;  %vm1216_vm15 = vweird.f32 %v1875_v8 }
 0x4cf   : > { %v1184_v4 = vmul.f32 %v1183_v3, %v1159_v36  ;;  %vm1217_vm2 = vmor %vm1215_vm1, %vm1216_vm15  ;;  %v1261_v40 = vand.u32 2147483648, %v1249_v7  ;;  %v1259_v43 = vand.u32 2147483647, %v1249_v7  ;;  %vm1255_vm5 = vweird.f32 %v1249_v7 }
 0x4d0   : > { %v1212_v18 = vsub.f32 1.0, %v1211_v10  ;;  %v1239_v44 = vmul.f32 %v1238_v39, %v2326_v38  ;;  %v1845_v38 = vld [vmem:[%s2478_s13] ss:$0 sm:$0xff] }
 0x4d1   : > { %v1692_v9 = vclamps-f32 %v1184_v4, 1.0  ;;  %v1262_v2 = vor.u32 1.1754944e-38, %v1261_v40  ;;  %vm1260_vm7 = vcmp.eq.f32.partialorder %v1259_v43, 8.507059e+37 }
 0x4d2   : > { %v1213_v15 = vmul.f32 %v1875_v8, %v1212_v18 }
 0x4d3   : > { %v1268_v16 = vadd.f32 1.0, %v1692_v9 }
 0x4d4   : > { %v1214_v28 = vadd.f32 %v1875_v8, %v1213_v15  ;;  %v1877_v30 = vpop.eup %1876 }
 0x4d5   : > { %v1272_v25 = vmul.f32 %v1268_v16, %v1100_v51  ;;  %v1251_v26 = vmul.f32 %v1877_v30, %v1249_v7  ;;  %vm1256_vm4 = vweird.f32 %v1877_v30 }
 0x4d6   : > { %v1218_v31 = vsel %vm1217_vm2, %v1875_v8, %v1214_v28  ;;  %vm1257_vm6 = vmor %vm1255_vm5, %vm1256_vm4 }
 0x4d7   : > { %v1283_v12 = vpack.c.bf16 %v1272_v25, %v1271_v13  ;;  %v1223_v32 = vsel %vm1220_vm3, %v1222_v53, %v1218_v31  ;;  %v1252_v14 = vsub.f32 1.0, %v1251_v26 }
 0x4d8   : > { %v1224_v35 = vmul.f32 %v1223_v32, %v1199_v34 }
 0x4d9   : > { %1711 = vmatmul.msk.bf16.vlgmr.msra.gmra.mxu3 %vm577_vm0, %v1283_v12  ;;  %v1253_v42 = vmul.f32 %v1877_v30, %v1252_v14 }
 0x4da   : > { %v1693_v48 = vclamps-f32 %v1224_v35, 1.0 }
 0x4db   : > { %v1254_v33 = vadd.f32 %v1877_v30, %v1253_v42 }
 0x4dc   : > { %v1269_v50 = vadd.f32 1.0, %v1693_v48 }
 0x4dd   : > { %v1258_v37 = vsel %vm1257_vm6, %v1877_v30, %v1254_v33 }
 0x4de   : > { %v1263_v47 = vsel %vm1260_vm7, %v1262_v2, %v1258_v37  ;;  %v1273_v57 = vmul.f32 %v1269_v50, %v1101_v52  ;;  %v1772_v37 = vld [vmem:[%s2481_s16 + $0x38] sm:$0xff] }
 0x4df   : > { %v1264_v49 = vmul.f32 %v1263_v47, %v1239_v44  ;;  %v1846_v44 = vld [vmem:[%s2479_s14] ss:$0 sm:$0xff]  ;;  %1774 = vmatpush.bf16.msrb.mxu1 %v1772_v37  ;;  %1520 = vmatpush.bf16.msrb.mxu0 %v1772_v37 }
 0x4e1   : > { %v1694_v45 = vclamps-f32 %v1264_v49, 1.0 }
 0x4e3   : > { %v1270_v56 = vadd.f32 1.0, %v1694_v45  ;;  %v1771_v45 = vld [vmem:[%s2481_s16 + $0x30] sm:$0xff] }
 0x4e4   : > { %1775 = vmatpush.bf16.msrb.mxu1 %v1771_v45  ;;  %1521 = vmatpush.bf16.msrb.mxu0 %v1771_v45 }
 0x4e5   : > { %v1274_v58 = vmul.f32 %v1270_v56, %v1102_v55 }
 0x4e7   : > { %v1284_v36 = vpack.c.bf16 %v1274_v58, %v1273_v57 }
 0x4e9   : > { %1712 = vmatmul.msk.bf16.gmra.mxu3 %vm577_vm0, %v1284_v36  ;;  %v1847_v36 = vld [vmem:[%s2480_s15] ss:$0 sm:$0xff] }
 0x55c   : > { %v1324_v60 = vpop.f32.mrf.mxu3 }
 0x55d   : > { %v1334_v61 = vadd.f32 %v1324_v60, %v2194_v11 }
 0x55f   : > { %v1342_v46 = vadd.f32 %v1845_v38, %v1334_v61 }
 0x561   : > { %1348 = vadd.xlane.f32.xlu2 %v1342_v46 }
 0x564   : > { %v1326_v63 = vpop.f32.mrf.mxu3 }
 0x565   : > { %v1335_v5 = vadd.f32 %v1326_v63, %v2198_v19 }
 0x567   : > { %v1343_v0 = vadd.f32 %v1845_v38, %v1335_v5 }
 0x569   : > { %1350 = vadd.xlane.f32.xlu0 %v1343_v0 }
 0x56c   : > { %v1329_v29 = vpop.f32.mrf.mxu3 }
 0x56d   : > { %v1336_v3 = vadd.f32 %v1329_v29, %v2202_v24  ;;  %v1769_v29 = vld [vmem:[%s2481_s16 + $0x20] sm:$0xff] }
 0x56f   : > { %v1344_v4 = vadd.f32 %v1845_v38, %v1336_v3 }
 0x571   : > { %1352 = vadd.xlane.f32.xlu1 %v1344_v4 }
 0x574   : > { %v1331_v6 = vpop.f32.mrf.mxu3 }
 0x575   : > { %v1337_v7 = vadd.f32 %v1331_v6, %v2206_v27 }
 0x577   : > { %v1345_v8 = vadd.f32 %v1845_v38, %v1337_v7 }
 0x579   : > { %1354 = vadd.xlane.f32.xlu2 %v1345_v8 }
 0x5d4   : > { %v1349_v1 = vpop.xlane.xlu2 %1348 }
 0x5d5   : > { %v1356_v11 = vmul.f32 %v1349_v1, %v2117_v22 }
 0x5d7   : > { %v1360_v54 = vsub.f32 %v1342_v46, %v1356_v11 }
 0x5d9   : > { %v1364_v9 = vmul.f32 %v1360_v54, %v1360_v54 }
 0x5db   : > { %1368 = vadd.xlane.f32.xlu0 %v1364_v9  ;;  %v1767_v9 = vld [vmem:[%s2481_s16 + $0x10] sm:$0xff] }
 0x5dc   : > { %v1351_v10 = vpop.xlane.xlu0 %1350 }
 0x5dd   : > { %v1357_v19 = vmul.f32 %v1351_v10, %v2117_v22 }
 0x5df   : > { %v1361_v62 = vsub.f32 %v1343_v0, %v1357_v19 }
 0x5e1   : > { %v1365_v51 = vmul.f32 %v1361_v62, %v1361_v62 }
 0x5e3   : > { %1370 = vadd.xlane.f32.xlu1 %v1365_v51  ;;  %v1766_v51 = vld [vmem:[%s2481_s16 + $0x8] sm:$0xff] }
 0x5e4   : > { %v1353_v24 = vpop.xlane.xlu1 %1352 }
 0x5e5   : > { %v1358_v16 = vmul.f32 %v1353_v24, %v2117_v22 }
 0x5e7   : > { %v2382_v17 = vsub.f32 %v1344_v4, %v1358_v16 }
 0x5e9   : > { %v1366_v27 = vmul.f32 %v2382_v17, %v2382_v17 }
 0x5eb   : > { %1372 = vadd.xlane.f32.xlu2 %v1366_v27 }
 0x5ec   : > { %v1355_v18 = vpop.xlane.xlu2 %1354 }
 0x5ed   : > { %v1359_v20 = vmul.f32 %v1355_v18, %v2117_v22 }
 0x5ef   : > { %v2387_v21 = vsub.f32 %v1345_v8, %v1359_v20  ;;  %v1768_v8 = vld [vmem:[%s2481_s16 + $0x18] sm:$0xff] }
 0x5f1   : > { %v1367_v23 = vmul.f32 %v2387_v21, %v2387_v21 }
 0x5f3   : > { %1374 = vadd.xlane.f32.xlu0 %v1367_v23 }
 0x64e   : > { %v1369_v13 = vpop.xlane.xlu0 %1368 }
 0x64f   : > { %v1376_v25 = vmul.f32 %v1369_v13, %v2117_v22 }
 0x651   : > { %v1380_v15 = vadd.f32 1e-05, %v1376_v25 }
 0x653   : > { %1878 = vrsqrt.f32 %v1380_v15  ;;  %vm1390_vm9 = vweird.f32 %v1380_v15 }
 0x656   : > { %v1371_v41 = vpop.xlane.xlu1 %1370 }
 0x657   : > { %v1377_v28 = vmul.f32 %v1371_v41, %v2117_v22 }
 0x659   : > { %v1879_v12 = vpop.eup %1878  ;;  %v1381_v30 = vadd.f32 1e-05, %v1377_v28 }
 0x65a   : > { %v1385_v53 = vmul.f32 %v1879_v12, %v1380_v15  ;;  %vm1391_vm8 = vweird.f32 %v1879_v12 }
 0x65b   : > { %1880 = vrsqrt.f32 %v1381_v30  ;;  %vm1392_vm10 = vmor %vm1390_vm9, %vm1391_vm8  ;;  %vm1400_vm12 = vweird.f32 %v1381_v30 }
 0x65c   : > { %v1386_v59 = vmul.f32 %v1879_v12, %v1385_v53 }
 0x65e   : > { %v1387_v31 = vmul.f32 0.5, %v1386_v59  ;;  %v1373_v39 = vpop.xlane.xlu2 %1372 }
 0x65f   : > { %v1378_v40 = vmul.f32 %v1373_v39, %v2117_v22 }
 0x660   : > { %v1388_v26 = vsub.f32 1.5, %v1387_v31 }
 0x661   : > { %v1881_v32 = vpop.eup %1880  ;;  %v1382_v42 = vadd.f32 1e-05, %v1378_v40 }
 0x662   : > { %v1389_v34 = vmul.f32 %v1879_v12, %v1388_v26  ;;  %v1395_v14 = vmul.f32 %v1881_v32, %v1381_v30  ;;  %vm1401_vm11 = vweird.f32 %v1881_v32 }
 0x663   : > { %1882 = vrsqrt.f32 %v1382_v42  ;;  %vm1402_vm13 = vmor %vm1400_vm12, %vm1401_vm11  ;;  %vm1410_vm15 = vweird.f32 %v1382_v42 }
 0x664   : > { %v1396_v35 = vmul.f32 %v1881_v32, %v1395_v14  ;;  %v1393_v43 = vsel %vm1392_vm10, %v1879_v12, %v1389_v34 }
 0x665   : > { %v1424_v48 = vmul.f32 %v1393_v43, %v1360_v54 }
 0x666   : > { %v1397_v33 = vmul.f32 0.5, %v1396_v35  ;;  %v1375_v49 = vpop.xlane.xlu0 %1374 }
 0x667   : > { %v1379_v50 = vmul.f32 %v1375_v49, %v2117_v22  ;;  %v1431_v58 = vmul.f32 %v1846_v44, %v1424_v48  ;;  %v1770_v22 = vld [vmem:[%s2481_s16 + $0x28] sm:$0xff] }
 0x668   : > { %v1398_v2 = vsub.f32 1.5, %v1397_v33  ;;  %1776 = vmatpush.bf16.msrb.mxu1 %v1770_v22  ;;  %1522 = vmatpush.bf16.msrb.mxu0 %v1770_v22 }
 0x669   : > { %v1883_v55 = vpop.eup %1882  ;;  %v1383_v57 = vadd.f32 1e-05, %v1379_v50  ;;  %v1438_v46 = vadd.f32 %v1847_v36, %v1431_v58 }
 0x66a   : > { %v1399_v47 = vmul.f32 %v1881_v32, %v1398_v2  ;;  %v1405_v38 = vmul.f32 %v1883_v55, %v1382_v42  ;;  %vm1411_vm14 = vweird.f32 %v1883_v55 }
 0x66b   : > { %1884 = vrsqrt.f32 %v1383_v57  ;;  %vm1412_vm1 = vmor %vm1410_vm15, %vm1411_vm14  ;;  %vm1420_vm3 = vweird.f32 %v1383_v57 }
 0x66c   : > { %v1403_v52 = vsel %vm1402_vm13, %v1881_v32, %v1399_v47  ;;  %v1406_v61 = vmul.f32 %v1883_v55, %v1405_v38  ;;  %1777 = vmatpush.bf16.msrb.mxu1 %v1769_v29  ;;  %1523 = vmatpush.bf16.msrb.mxu0 %v1769_v29 }
 0x66d   : > { %v1425_v56 = vmul.f32 %v1403_v52, %v1361_v62 }
 0x66e   : > { %v1407_v5 = vmul.f32 0.5, %v1406_v61 }
 0x66f   : > { %v1432_v60 = vmul.f32 %v1846_v44, %v1425_v56 }
 0x670   : > { %v1408_v3 = vsub.f32 1.5, %v1407_v5  ;;  %1778 = vmatpush.bf16.msrb.mxu1 %v1768_v8  ;;  %1524 = vmatpush.bf16.msrb.mxu0 %v1768_v8 }
 0x671   : > { %v1439_v63 = vadd.f32 %v1847_v36, %v1432_v60  ;;  %v1885_v4 = vpop.eup %1884 }
 0x672   : > { %v1409_v6 = vmul.f32 %v1883_v55, %v1408_v3  ;;  %v1415_v7 = vmul.f32 %v1885_v4, %v1383_v57  ;;  %vm1421_vm2 = vweird.f32 %v1885_v4 }
 0x673   : > { %v1830_v0 = vpack.i.bf16 %v1439_v63, %v1438_v46  ;;  %vm1422_vm4 = vmor %vm1420_vm3, %vm1421_vm2 }
 0x674   : > { %v1416_v1 = vmul.f32 %v1885_v4, %v1415_v7  ;;  %v1413_v11 = vsel %vm1412_vm1, %v1883_v55, %v1409_v6  ;;  %1779 = vmatpush.bf16.msrb.mxu1 %v1767_v9  ;;  %1525 = vmatpush.bf16.msrb.mxu0 %v1767_v9 }
 0x675   : > { %1831 = vrot.lane.b32.xlu1 %v1830_v0, %s1953_s24  ;;  %v1426_v19 = vmul.f32 %v1413_v11, %v2382_v17  ;;  %v1765_v17 = vld [vmem:[%s2481_s16] sm:$0xff] }
 0x676   : > { %v1417_v54 = vmul.f32 0.5, %v1416_v1 }
 0x677   : > { %v1433_v27 = vmul.f32 %v1846_v44, %v1426_v19 }
 0x678   : > { %v1418_v10 = vsub.f32 1.5, %v1417_v54  ;;  %1780 = vmatpush.bf16.msrb.mxu1 %v1766_v51  ;;  %1526 = vmatpush.bf16.msrb.mxu0 %v1766_v51 }
 0x679   : > { %v1440_v20 = vadd.f32 %v1847_v36, %v1433_v27 }
 0x67a   : > { %v1419_v62 = vmul.f32 %v1885_v4, %v1418_v10 }
 0x67c   : > { %v1423_v24 = vsel %vm1422_vm4, %v1885_v4, %v1419_v62  ;;  %1781 = vmatpush.bf16.msrb.mxu1 %v1765_v17  ;;  %1527 = vmatpush.bf16.msrb.mxu0 %v1765_v17 }
 0x67d   : > { %v1427_v16 = vmul.f32 %v1423_v24, %v2387_v21 }
 0x67f   : > { %v1434_v18 = vmul.f32 %v1846_v44, %v1427_v16 }
 0x681   : > { %v1441_v23 = vadd.f32 %v1847_v36, %v1434_v18 }
 0x683   : > { %v1835_v13 = vpack.i.bf16 %v1441_v23, %v1440_v20 }
 0x685   : > { %1836 = vrot.lane.b32.xlu2 %v1835_v13, %s1953_s24  ;;  %s558_s24 = scalar_lea.vmem [#allocation3], %s1637_s18 }
 0x686   : > { %s1556_s21 = sshll.u32 %s558_s24, 4  ;;  %s1557_s21 = int_to_ptr.vmem [resolvable:$true] %s1556_s21 }
 0x6df   : > { %v1837_v25 = vpop.permute.xlu2 %1836 }
 0x6e0   : > { %v1839_v15 = vunpack.i.h.bf16 %v1837_v25  ;;  %v1838_v41 = vunpack.i.l.bf16 %v1837_v25 }
 0x6e2   : > { %v1453_v21 = vmax.f32 %v1441_v23, %v1839_v15  ;;  %v1452_v28 = vmax.f32 %v1440_v20, %v1838_v41 }
 0x6e4   : > { %v1471_v30 = vpack.c.bf16 %v1453_v21, %v1452_v28 }
 0x6e6   : > { %1533 = vmatmul.bf16.vlgmr.msrb.gmra.mxu1 %v1471_v30 }
 0x6e7   : > { %v1832_v12 = vpop.permute.xlu1 %1831 }
 0x6e8   : > { %v1834_v53 = vunpack.i.h.bf16 %v1832_v12  ;;  %v1833_v59 = vunpack.i.l.bf16 %v1832_v12 }
 0x6ea   : > { %v1451_v31 = vmax.f32 %v1439_v63, %v1834_v53  ;;  %v1450_v26 = vmax.f32 %v1438_v46, %v1833_v59 }
 0x6ec   : > { %v1470_v32 = vpack.c.bf16 %v1451_v31, %v1450_v26 }
 0x6ee   : > { %1528 = vmatmul.bf16.vlgmr.msrb.gmra.mxu0 %v1470_v32 }
 0x763   : > { %v1534_v34 = vpop.f32.mrf.mxu1 }
 0x764   : > { %1541 = vst.msk [vmem:[%s558_s24 + $0x10] sm:$0xff] %vm577_vm0, %v1534_v34 }
 0x76b   : > { %v1529_v14 = vpop.f32.mrf.mxu0  ;;  %v1536_v39 = vpop.f32.mrf.mxu1 }
 0x76c   : > { %1539 = vst.msk [vmem:[%s558_s24] sm:$0xff] %vm577_vm0, %v1529_v14 }
 0x76d   : > { %1542 = vst.msk [vmem:[%s558_s24 + $0x18] sm:$0xff] %vm577_vm0, %v1536_v39 }
 0x773   : > { %v1531_v40 = vpop.f32.mrf.mxu0 }
 0x774   : > { %1540 = vst.msk [vmem:[%s558_s24 + $0x8] sm:$0xff] %vm577_vm0, %v1531_v40 }
 0x775   : > { %1913 = shalt.err (!%p1910_p3)
}
 0x776   : > { %s1954_s30 = smov 128   ;;  %s1955_s24 = smov 8  }
 0x777   : > { %1782 = dma.vmem_to_hbm [thread:$0]  (%p2084_p5), %s1557_s21, 512, %s1559_s22, %s1544_s23, %s1954_s30, %s1954_s30, %s1955_s24  }
 0x778 PF: > { %s2503_s2 = sld [smem:[#allocation6_spill]]  ;;  %p1788_p4 = scmp.ge.s32.totalorder %s1948_s27, 2 }
 0x77a   : > { %p1785_p7 = pnand %p1788_p4, %p2088_p6 }
 0x77c   : > { %p1786_p8 = pneg %p1785_p7 }
 0x77e   : > { %s1573_s18 = sand.u32 1, %s2503_s2  }
 0x77f   : > { %s1574_s26 = scalar_lea.sflag [#allocation4], %s1573_s18 }
 0x780   : > { %1931 = dma.done.wait (%p1786_p8), %s1574_s26, 512  }
 0x781   : > { %1933 = vsyncadd (%p1786_p8), %s1574_s26, 4294966784  ;;  %s2505_s27 = sld [smem:[#allocation8_spill]]  ;;  %s2508_s24 = smov %s1940_s25 }
 0x782   : > { %s2506_s28 = sld [smem:[#allocation7_spill]] }
 0x783   : > { %s2507_s26 = sld [smem:[#allocation9_spill]] }
 0x787   : > { %p27_p9 = scmp.ge.s32.totalorder %s2505_s27, 4  }
 0x788   : > { %s2509_s25 = smov %s2506_s28 }
 0x789   :  { %29 = sbr.rel (!%p27_p9) target bundleno = 8 (0x8), region = 126 }
 0x78e   :  { %1580 = vsyncpa [#allocation4], 1 }
 0x78f   :  { %1582 = vsyncpa [#allocation4 + $0x1], 1 }

</bundles_post_ra>
